<compile_context>
chip_gen: v7x
topology: tpu7x:2x2x1
jax: 0.10.0
libtpu: 0.0.40
codegen_flags: <defaults>
</compile_context>

<pallas_src>
import functools
import math

import jax
import jax.numpy as jnp
from jax import lax
from jax.experimental import pallas as pl
from jax.experimental.pallas import tpu as pltpu

# Synthetic model hyper-parameters (DDSP decoder, small shapes).
HIDDEN = 32          # GRU / MLP hidden size
N_HARMONIC = 16      # harmonic amplitudes (proj0 outputs N_HARMONIC + 1)
N_BANDS = 8          # noise filter bands
BLOCK_SIZE = 4       # pitch/loudness decimation factor
SAMPLING_RATE = 16000
MEAN_LOUDNESS = -40.0
STD_LOUDNESS = 25.0

LN10 = math.log(10.0)

_H = HIDDEN
_H2 = 2 * _H
_H3 = 3 * _H
N_PROJ = N_HARMONIC + N_BANDS + 1    # [harmonics | noise | total_amp] (reordered)

# ---- row layout of the packed bf16 parameter slab (N_ROWS x 128) ----------
# Matrix blocks (row offsets are multiples of 32; padding lanes are zero so
# full-width 128-lane RHS reads are exact):
R_INW1 = 0                 # fused in-MLP layer-1 weight^T, block-diag (2H, 2H)
R_INW2 = R_INW1 + _H2      # fused in-MLP layer-2 weight^T, block-diag (2H, 2H)
R_WIH = R_INW2 + _H2       # GRU weight_ih^T, [pitch half ; loud half] (2H, 3H)
R_WHH = R_WIH + _H2        # GRU weight_hh^T (H, 3H)
R_OWG = R_WHH + _H         # out-MLP layer-0, gru slab (H, H)
R_OW1 = R_OWG + _H         # out-MLP layer-1 weight^T (H, H)
R_OW2 = R_OW1 + _H         # out-MLP layer-2 weight^T (H, H)
R_PROJ = R_OW2 + _H        # fused projection weight^T (H, NH+NB+1), reordered
# Vector section (one logical row each):
_V = R_PROJ + _H
R_INW0 = _V + 0            # fused in-MLP layer-0 weight (1, 2H)
R_INB = _V + 1             # 3 rows: fused in-MLP biases (1, 2H)
R_ING = _V + 4             # 3 rows: fused LN gamma (1, 2H)
R_INBT = _V + 7            # 3 rows: fused LN beta (1, 2H)
R_BIH = _V + 10            # GRU bias_ih (1, 3H)
R_BHH = _V + 11            # GRU bias_hh (1, 3H)
R_OWP = _V + 12            # out-MLP layer-0 pitch column (1, H)
R_OWL = _V + 13            # out-MLP layer-0 loudness column (1, H)
R_OB = _V + 14             # 3 rows: out-MLP biases (1, H)
R_OG = _V + 17             # 3 rows: out-MLP LN gamma (1, H)
R_OBT = _V + 20            # 3 rows: out-MLP LN beta (1, H)
R_BPRJ = _V + 23           # fused projection bias, reordered, -5 folded (1, NP)
_N_ROWS_RAW = _V + 24
N_ROWS = ((_N_ROWS_RAW + 15) // 16) * 16   # bf16 sublane tile alignment

# Lane layout of the single lane-dense (F, 128) data input.
LANE_PITCH = 0
LANE_LOUD = 1
LANE_H0 = 64               # GRU cache, row 0 only

# Lane layout of the single lane-dense (F, 128) output.
LANE_AMP = 0
LANE_NOISE = N_HARMONIC
LANE_CACHE = 32
OUT_LANES = 128


def _leaky_relu(x):
    return jnp.where(x > 0, x, 0.01 * x)


def _layer_norm(x, g, b):
    mu = jnp.mean(x, axis=-1, keepdims=True)
    var = jnp.mean((x - mu) ** 2, axis=-1, keepdims=True)
    return (x - mu) * lax.rsqrt(var + 1e-5) * g + b


def _ln_halves(x, g, b, left, inv_n):
    """Independent LayerNorm over each H-lane half of a (F, 2H) tensor."""
    x0 = jnp.where(left, x, 0.0)
    x1 = x - x0
    mu = jnp.where(left,
                   jnp.sum(x0, axis=-1, keepdims=True),
                   jnp.sum(x1, axis=-1, keepdims=True)) * inv_n
    d = x - mu
    d0 = jnp.where(left, d, 0.0)
    d1 = d - d0
    var = jnp.where(left,
                    jnp.sum(d0 * d0, axis=-1, keepdims=True),
                    jnp.sum(d1 * d1, axis=-1, keepdims=True)) * inv_n
    return d * lax.rsqrt(var + 1e-5) * g + b


def _scale_fn(x):
    # DDSP scale_function: 2 * sigmoid(x)**log(10) + 1e-7  (sigmoid > 0).
    s = jax.nn.sigmoid(x)
    return 2.0 * jnp.exp(LN10 * jnp.log(s)) + 1e-7


def _ddsp_kernel(inp_ref, w_ref, out_ref, gru_ref, *, hidden, n_frames,
                 n_harm, n_bands, sampling_rate):
    f32, bf16 = jnp.float32, jnp.bfloat16
    H, H2, H3 = hidden, 2 * hidden, 3 * hidden
    F = n_frames
    NP = n_harm + n_bands + 1

    def vec(row, width):                         # f32 view of one vector row
        return w_ref[row:row + 1, 0:width].astype(f32)

    def mat(row, rows):                          # full-width bf16 matrix block
        return w_ref[row:row + rows, :]

    pitch = inp_ref[:, LANE_PITCH:LANE_PITCH + 1]                       # (F, 1)
    loud = (inp_ref[:, LANE_LOUD:LANE_LOUD + 1] - MEAN_LOUDNESS) * (1.0 / STD_LOUDNESS)
    h = inp_ref[0:1, LANE_H0:LANE_H0 + H]                               # GRU cache (1, H)

    # ---- both input MLPs fused: pitch branch lanes 0:H, loudness lanes H:2H.
    left = lax.broadcasted_iota(jnp.int32, (F, H2), 1) < H
    inv_h = 1.0 / H
    x = jnp.where(left, jnp.broadcast_to(pitch, (F, H2)),
                  jnp.broadcast_to(loud, (F, H2)))
    hx = x * vec(R_INW0, H2) + vec(R_INB, H2)
    hx = _leaky_relu(_ln_halves(hx, vec(R_ING, H2), vec(R_INBT, H2), left, inv_h))
    hx = (jnp.dot(hx.astype(bf16), mat(R_INW1, H2),
                  preferred_element_type=f32)[:, 0:H2] + vec(R_INB + 1, H2))
    hx = _leaky_relu(_ln_halves(hx, vec(R_ING + 1, H2), vec(R_INBT + 1, H2), left, inv_h))
    hx = (jnp.dot(hx.astype(bf16), mat(R_INW2, H2),
                  preferred_element_type=f32)[:, 0:H2] + vec(R_INB + 2, H2))
    hx = _leaky_relu(_ln_halves(hx, vec(R_ING + 2, H2), vec(R_INBT + 2, H2), left, inv_h))
    # hx == cat([hp, hl], -1) already concatenated -> GRU input.

    # GRU input projection for every frame: one fused (F,2H)x(2H,3H) matmul.
    gx = (jnp.dot(hx.astype(bf16), mat(R_WIH, H2),
                  preferred_element_type=f32) + vec(R_BIH, 128))        # (F, 128)

    whh = mat(R_WHH, H)                                                  # (H, 128) bf16
    bhh = vec(R_BHH, 128)                                                # (1, 128)

    # GRU recurrence, fully unrolled; hidden state lives in vregs.
    # TODO(synk): on v7x an explicit weight-stationary matmul_push_rhs/pop
    # sequence (MRB-addressed) could further shorten the per-step MXU trip.
    for t in range(F):
        gx_t = gx[t:t + 1, :]                                            # static row slice
        gh = jnp.dot(h.astype(bf16), whh, preferred_element_type=f32) + bhh
        rz = jax.nn.sigmoid(gx_t[:, 0:H2] + gh[:, 0:H2])                 # r and z fused
        r, z = rz[:, 0:H], rz[:, H:H2]
        n = jnp.tanh(gx_t[:, H2:H3] + r * gh[:, H2:H3])
        h = (1.0 - z) * n + z * h
        gru_ref[t:t + 1, :] = h                   # per-step row store (vst slot)
    gru_out = gru_ref[...]                        # (F, H)

    # out_mlp on cat([gru_out, pitch, loudness], -1); layer 0 decomposed.
    y = (jnp.dot(gru_out.astype(bf16), mat(R_OWG, H),
                 preferred_element_type=f32)[:, 0:H]
         + pitch * vec(R_OWP, H) + loud * vec(R_OWL, H) + vec(R_OB, H))
    y = _leaky_relu(_layer_norm(y, vec(R_OG, H), vec(R_OBT, H)))
    y = (jnp.dot(y.astype(bf16), mat(R_OW1, H),
                 preferred_element_type=f32)[:, 0:H] + vec(R_OB + 1, H))
    y = _leaky_relu(_layer_norm(y, vec(R_OG + 1, H), vec(R_OBT + 1, H)))
    y = (jnp.dot(y.astype(bf16), mat(R_OW2, H),
                 preferred_element_type=f32)[:, 0:H] + vec(R_OB + 2, H))
    y = _leaky_relu(_layer_norm(y, vec(R_OG + 2, H), vec(R_OBT + 2, H)))

    # Fused projection, columns pre-ordered [harmonics | noise | total_amp];
    # the noise branch's "-5" offset is folded into its bias in the wrapper.
    param = _scale_fn(jnp.dot(y.astype(bf16), mat(R_PROJ, H),
                              preferred_element_type=f32)[:, 0:NP]
                      + vec(R_BPRJ, NP))                                 # (F, NP)
    amps = param[:, 0:n_harm]
    noise = param[:, n_harm:n_harm + n_bands]
    total_amp = param[:, NP - 1:NP]

    # remove_above_nyquist, normalize, scale by total amplitude.
    harm = (lax.broadcasted_iota(jnp.int32, (F, n_harm), 1) + 1).astype(f32)
    aa = (pitch * harm < sampling_rate / 2.0).astype(f32) + 1e-4
    amps = amps * aa
    amps = amps * pl.reciprocal(jnp.sum(amps, axis=-1, keepdims=True), approx=True)
    amps = amps * total_amp

    # Direct lane-sliced stores; padding lanes are never read by the wrapper.
    out_ref[:, LANE_AMP:LANE_AMP + n_harm] = amps
    out_ref[:, LANE_NOISE:LANE_NOISE + n_bands] = noise
    out_ref[0:1, LANE_CACHE:LANE_CACHE + H] = h                          # updated cache


def pack_params(p):
    """Pack all weights/biases into one lane-dense (N_ROWS, 128) bf16 slab."""
    H = HIDDEN
    slab = jnp.zeros((N_ROWS, 128), jnp.float32)

    def put(slab, row, arr):
        arr = jnp.asarray(arr, jnp.float32)
        if arr.ndim == 1:
            arr = arr[None, :]
        r, c = arr.shape
        return slab.at[row:row + r, 0:c].set(arr)

    def block_diag(a, b):
        z = jnp.zeros((H, H), jnp.float32)
        return jnp.concatenate(
            [jnp.concatenate([a, z], axis=1),
             jnp.concatenate([z, b], axis=1)], axis=0)

    slab = put(slab, R_INW1, block_diag(p["in_p"]["w1"], p["in_l"]["w1"]))
    slab = put(slab, R_INW2, block_diag(p["in_p"]["w2"], p["in_l"]["w2"]))
    slab = put(slab, R_WIH, p["wih"])
    slab = put(slab, R_WHH, p["whh"])
    slab = put(slab, R_OWG, p["ow_g"])
    slab = put(slab, R_OW1, p["ow1"])
    slab = put(slab, R_OW2, p["ow2"])
    # Projection reordered to [harmonics | noise | total_amp].
    w0, w1 = p["w_proj0"], p["w_proj1"]
    slab = put(slab, R_PROJ, jnp.concatenate([w0[:, 1:], w1, w0[:, 0:1]], axis=1))

    slab = put(slab, R_INW0,
               jnp.concatenate([p["in_p"]["w0"], p["in_l"]["w0"]], axis=1))
    for i in range(3):
        slab = put(slab, R_INB + i,
                   jnp.concatenate([p["in_p"]["b"][i], p["in_l"]["b"][i]], axis=0))
        slab = put(slab, R_ING + i,
                   jnp.concatenate([p["in_p"]["g"][i], p["in_l"]["g"][i]], axis=0))
        slab = put(slab, R_INBT + i,
                   jnp.concatenate([p["in_p"]["bt"][i], p["in_l"]["bt"][i]], axis=0))
    slab = put(slab, R_BIH, p["bih"])
    slab = put(slab, R_BHH, p["bhh"])
    slab = put(slab, R_OWP, p["ow_p"])
    slab = put(slab, R_OWL, p["ow_l"])
    for i in range(3):
        slab = put(slab, R_OB + i, p["ob"][i])
        slab = put(slab, R_OG + i, p["og"][i])
        slab = put(slab, R_OBT + i, p["obt"][i])
    # noise = scale_fn(proj1(y) - 5): fold the -5 into the noise bias lanes.
    b0, b1 = p["b_proj0"], p["b_proj1"] - 5.0
    slab = put(slab, R_BPRJ, jnp.concatenate([b0[1:], b1, b0[0:1]], axis=0))
    return slab.astype(jnp.bfloat16)


def ddsp_control_decoder(pitch, loudness, param_slab, cache_gru):
    """pitch, loudness: (1, T, 1) float32; cache_gru: (1, 1, HIDDEN)."""
    assert pitch.shape[0] == 1 and loudness.shape[0] == 1
    p = pitch[:, ::BLOCK_SIZE]                    # (1, F, 1) pitch frames (returned)
    l = loudness[:, ::BLOCK_SIZE]                 # (1, F, 1)
    F = p.shape[1]

    # One lane-dense (F, 128) data operand: pitch | loudness | GRU cache row.
    # TODO(synk): full-rate decimation could move in-kernel (strided pl.ds read)
    # and the bf16 param slab could be kept VMEM-resident across calls.
    inp = jnp.zeros((F, 128), jnp.float32)
    inp = inp.at[:, LANE_PITCH].set(p[0, :, 0])
    inp = inp.at[:, LANE_LOUD].set(l[0, :, 0])
    inp = inp.at[0, LANE_H0:LANE_H0 + HIDDEN].set(
        cache_gru.reshape(HIDDEN).astype(jnp.float32))

    kernel = functools.partial(
        _ddsp_kernel, hidden=HIDDEN, n_frames=F, n_harm=N_HARMONIC,
        n_bands=N_BANDS, sampling_rate=SAMPLING_RATE)

    out = pl.pallas_call(
        kernel,
        out_shape=jax.ShapeDtypeStruct((F, OUT_LANES), jnp.float32),
        in_specs=[pl.BlockSpec(memory_space=pltpu.MemorySpace.VMEM)] * 2,
        out_specs=pl.BlockSpec(memory_space=pltpu.MemorySpace.VMEM),
        scratch_shapes=[pltpu.VMEM((F, HIDDEN), jnp.float32)],
    )(inp, param_slab)

    amps = out[None, :, LANE_AMP:LANE_AMP + N_HARMONIC]
    noise = out[None, :, LANE_NOISE:LANE_NOISE + N_BANDS]
    cache = out[None, 0:1, LANE_CACHE:LANE_CACHE + HIDDEN]
    # TODO(synk): PyTorch's in-place `cache_gru.copy_(cache)` buffer mutation has
    # no pure-functional equivalent; the updated cache is returned instead.
    return amps, p, noise, cache


def init_params(key):
    """Deterministic synthetic weights matching the DDSP decoder shapes."""
    H, NH, NB = HIDDEN, N_HARMONIC, N_BANDS
    keys = iter(jax.random.split(key, 64))

    def u(shape, fan_in):
        a = 1.0 / math.sqrt(fan_in)
        return jax.random.uniform(next(keys), shape, jnp.float32, -a, a)

    def mlp(in_size):
        return dict(
            w0=u((1, H), in_size),                 # Linear(in, H) weight^T
            w1=u((H, H), H), w2=u((H, H), H),      # layers 1, 2 weight^T
            b=jnp.stack([u((H,), in_size), u((H,), H), u((H,), H)]),
            g=jnp.ones((3, H), jnp.float32),       # LayerNorm gamma
            bt=jnp.zeros((3, H), jnp.float32))     # LayerNorm beta

    return dict(
        in_p=mlp(1), in_l=mlp(1),
        # GRU(input=2H, hidden=H); gates ordered r|z|n along the 3H axis.
        wih=u((2 * H, 3 * H), 2 * H),              # weight_ih^T (pitch;loud halves)
        whh=u((H, 3 * H), H),                      # weight_hh^T
        bih=u((3 * H,), H), bhh=u((3 * H,), H),
        # out MLP: Linear(H+2, H) decomposed into gru / pitch / loudness slabs.
        ow_g=u((H, H), H + 2), ow_p=u((1, H), H + 2), ow_l=u((1, H), H + 2),
        ow1=u((H, H), H), ow2=u((H, H), H),
        ob=jnp.stack([u((H,), H + 2), u((H,), H), u((H,), H)]),
        og=jnp.ones((3, H), jnp.float32), obt=jnp.zeros((3, H), jnp.float32),
        # proj0 = Linear(H, NH+1) (first column = total_amp), proj1 = Linear(H, NB).
        w_proj0=u((H, NH + 1), H), b_proj0=u((NH + 1,), H),
        w_proj1=u((H, NB), H), b_proj1=u((NB,), H),
    )


if __name__ == "__main__":
    key = jax.random.PRNGKey(0)
    k_pitch, k_loud = jax.random.split(key)

    B, T = 1, BLOCK_SIZE * 8                       # 8 control frames after decimation
    pitch = jax.random.uniform(k_pitch, (B, T, 1), jnp.float32, 100.0, 800.0)
    loudness = jax.random.uniform(k_loud, (B, T, 1), jnp.float32, -80.0, 0.0)

    params = init_params(jax.random.PRNGKey(42))
    param_slab = pack_params(params)
    cache_gru = jnp.zeros((1, 1, HIDDEN), jnp.float32)

    amps, pitch_frames, noise, cache = ddsp_control_decoder(
        pitch, loudness, param_slab, cache_gru)
    jax.block_until_ready((amps, pitch_frames, noise, cache))

    assert amps.shape == (1, 8, N_HARMONIC)
    assert pitch_frames.shape == (1, 8, 1)
    assert noise.shape == (1, 8, N_BANDS)
    assert cache.shape == (1, 1, HIDDEN)
    assert bool(jnp.all(jnp.isfinite(amps)))
    assert bool(jnp.all(jnp.isfinite(noise)))
    assert bool(jnp.all(jnp.isfinite(cache)))
    print("KERNEL_OK")
</pallas_src>

<mosaic_0001>
module attributes {stable_mosaic.version = 11 : i64} {
  func.func @_ddsp_kernel(%arg0: memref<8x128xf32, #tpu.memory_space<vmem>>, %arg1: memref<384x128xbf16, #tpu.memory_space<vmem>>, %arg2: memref<8x128xf32, #tpu.memory_space<vmem>>, %arg3: memref<8x32xf32, #tpu.memory_space<vmem>>) attributes {dimension_semantics = [], scalar_prefetch = 0 : i64, scratch_operands = 1 : i64, tpu.core_type = #tpu.core_type<tc>} {
    %c0 = arith.constant 0 : index
    %c0_0 = arith.constant 0 : index
    %0 = vector.load %arg0[%c0, %c0_0] : memref<8x128xf32, #tpu.memory_space<vmem>>, vector<8x1xf32>
    %c0_1 = arith.constant 0 : index
    %c1 = arith.constant 1 : index
    %1 = vector.load %arg0[%c0_1, %c1] : memref<8x128xf32, #tpu.memory_space<vmem>>, vector<8x1xf32>
    %cst = arith.constant -4.000000e+01 : f32
    %2 = vector.broadcast %cst : f32 to vector<8x1xf32>
    %3 = arith.subf %1, %2 : vector<8x1xf32>
    %cst_2 = arith.constant 4.000000e-02 : f32
    %4 = vector.broadcast %cst_2 : f32 to vector<8x1xf32>
    %5 = arith.mulf %3, %4 : vector<8x1xf32>
    %c0_3 = arith.constant 0 : index
    %c64 = arith.constant 64 : index
    %6 = vector.load %arg0[%c0_3, %c64] : memref<8x128xf32, #tpu.memory_space<vmem>>, vector<1x32xf32>
    %7 = tpu.iota {dimensions = array<i32: 1>} : vector<8x64xi32>
    %c32_i32 = arith.constant 32 : i32
    %8 = vector.broadcast %c32_i32 : i32 to vector<8x64xi32>
    %9 = arith.cmpi slt, %7, %8 : vector<8x64xi32>
    %10 = vector.shape_cast %0 : vector<8x1xf32> to vector<8x1xf32>
    %11 = vector.broadcast %10 : vector<8x1xf32> to vector<8x64xf32>
    %12 = vector.shape_cast %5 : vector<8x1xf32> to vector<8x1xf32>
    %13 = vector.broadcast %12 : vector<8x1xf32> to vector<8x64xf32>
    %14 = arith.select %9, %11, %13 : vector<8x64xi1>, vector<8x64xf32>
    %c352 = arith.constant 352 : index
    %c0_4 = arith.constant 0 : index
    %15 = vector.load %arg1[%c352, %c0_4] : memref<384x128xbf16, #tpu.memory_space<vmem>>, vector<1x64xbf16>
    %16 = arith.extf %15 : vector<1x64xbf16> to vector<1x64xf32>
    %17 = vector.broadcast %16 : vector<1x64xf32> to vector<8x64xf32>
    %18 = arith.mulf %14, %17 : vector<8x64xf32>
    %c353 = arith.constant 353 : index
    %c0_5 = arith.constant 0 : index
    %19 = vector.load %arg1[%c353, %c0_5] : memref<384x128xbf16, #tpu.memory_space<vmem>>, vector<1x64xbf16>
    %20 = arith.extf %19 : vector<1x64xbf16> to vector<1x64xf32>
    %21 = vector.broadcast %20 : vector<1x64xf32> to vector<8x64xf32>
    %22 = arith.addf %18, %21 : vector<8x64xf32>
    %c356 = arith.constant 356 : index
    %c0_6 = arith.constant 0 : index
    %23 = vector.load %arg1[%c356, %c0_6] : memref<384x128xbf16, #tpu.memory_space<vmem>>, vector<1x64xbf16>
    %24 = arith.extf %23 : vector<1x64xbf16> to vector<1x64xf32>
    %c359 = arith.constant 359 : index
    %c0_7 = arith.constant 0 : index
    %25 = vector.load %arg1[%c359, %c0_7] : memref<384x128xbf16, #tpu.memory_space<vmem>>, vector<1x64xbf16>
    %26 = arith.extf %25 : vector<1x64xbf16> to vector<1x64xf32>
    %cst_8 = arith.constant 0.000000e+00 : f32
    %27 = vector.broadcast %cst_8 : f32 to vector<8x64xf32>
    %28 = arith.select %9, %22, %27 : vector<8x64xi1>, vector<8x64xf32>
    %29 = arith.subf %22, %28 : vector<8x64xf32>
    %cst_9 = arith.constant dense<0.000000e+00> : vector<8xf32>
    %30 = vector.multi_reduction <add>, %28, %cst_9 [1] : vector<8x64xf32> to vector<8xf32>
    %31 = vector.shape_cast %30 : vector<8xf32> to vector<8x1xf32>
    %cst_10 = arith.constant dense<0.000000e+00> : vector<8xf32>
    %32 = vector.multi_reduction <add>, %29, %cst_10 [1] : vector<8x64xf32> to vector<8xf32>
    %33 = vector.shape_cast %32 : vector<8xf32> to vector<8x1xf32>
    %34 = vector.shape_cast %31 : vector<8x1xf32> to vector<8x1xf32>
    %35 = vector.broadcast %34 : vector<8x1xf32> to vector<8x64xf32>
    %36 = vector.shape_cast %33 : vector<8x1xf32> to vector<8x1xf32>
    %37 = vector.broadcast %36 : vector<8x1xf32> to vector<8x64xf32>
    %38 = arith.select %9, %35, %37 : vector<8x64xi1>, vector<8x64xf32>
    %cst_11 = arith.constant 3.125000e-02 : f32
    %39 = vector.broadcast %cst_11 : f32 to vector<8x64xf32>
    %40 = arith.mulf %38, %39 : vector<8x64xf32>
    %41 = arith.subf %22, %40 : vector<8x64xf32>
    %cst_12 = arith.constant 0.000000e+00 : f32
    %42 = vector.broadcast %cst_12 : f32 to vector<8x64xf32>
    %43 = arith.select %9, %41, %42 : vector<8x64xi1>, vector<8x64xf32>
    %44 = arith.subf %41, %43 : vector<8x64xf32>
    %45 = arith.mulf %43, %43 : vector<8x64xf32>
    %cst_13 = arith.constant dense<0.000000e+00> : vector<8xf32>
    %46 = vector.multi_reduction <add>, %45, %cst_13 [1] : vector<8x64xf32> to vector<8xf32>
    %47 = vector.shape_cast %46 : vector<8xf32> to vector<8x1xf32>
    %48 = arith.mulf %44, %44 : vector<8x64xf32>
    %cst_14 = arith.constant dense<0.000000e+00> : vector<8xf32>
    %49 = vector.multi_reduction <add>, %48, %cst_14 [1] : vector<8x64xf32> to vector<8xf32>
    %50 = vector.shape_cast %49 : vector<8xf32> to vector<8x1xf32>
    %51 = vector.shape_cast %47 : vector<8x1xf32> to vector<8x1xf32>
    %52 = vector.broadcast %51 : vector<8x1xf32> to vector<8x64xf32>
    %53 = vector.shape_cast %50 : vector<8x1xf32> to vector<8x1xf32>
    %54 = vector.broadcast %53 : vector<8x1xf32> to vector<8x64xf32>
    %55 = arith.select %9, %52, %54 : vector<8x64xi1>, vector<8x64xf32>
    %cst_15 = arith.constant 3.125000e-02 : f32
    %56 = vector.broadcast %cst_15 : f32 to vector<8x64xf32>
    %57 = arith.mulf %55, %56 : vector<8x64xf32>
    %cst_16 = arith.constant 9.99999974E-6 : f32
    %58 = vector.broadcast %cst_16 : f32 to vector<8x64xf32>
    %59 = arith.addf %57, %58 : vector<8x64xf32>
    %60 = math.rsqrt %59 : vector<8x64xf32>
    %61 = arith.mulf %41, %60 : vector<8x64xf32>
    %62 = vector.broadcast %24 : vector<1x64xf32> to vector<8x64xf32>
    %63 = arith.mulf %61, %62 : vector<8x64xf32>
    %64 = vector.broadcast %26 : vector<1x64xf32> to vector<8x64xf32>
    %65 = arith.addf %63, %64 : vector<8x64xf32>
    %cst_17 = arith.constant 0.000000e+00 : f32
    %66 = vector.broadcast %cst_17 : f32 to vector<8x64xf32>
    %67 = arith.cmpf ogt, %65, %66 : vector<8x64xf32>
    %cst_18 = arith.constant 0.00999999977 : f32
    %68 = vector.broadcast %cst_18 : f32 to vector<8x64xf32>
    %69 = arith.mulf %68, %65 : vector<8x64xf32>
    %70 = arith.select %67, %65, %69 : vector<8x64xi1>, vector<8x64xf32>
    %71 = arith.truncf %70 : vector<8x64xf32> to vector<8x64xbf16>
    %c0_19 = arith.constant 0 : index
    %c0_20 = arith.constant 0 : index
    %72 = vector.load %arg1[%c0_19, %c0_20] : memref<384x128xbf16, #tpu.memory_space<vmem>>, vector<64x128xbf16>
    %cst_21 = arith.constant dense<0.000000e+00> : vector<8x128xf32>
    %73 = tpu.matmul %71, %72, %cst_21 {dimension_numbers = #tpu.dot_dimension_numbers<[1], [0], [0], [1], [0, 0, 1, 1], [], []>} : vector<8x64xbf16>, vector<64x128xbf16>, vector<8x128xf32> -> vector<8x128xf32>
    %74 = vector.extract_strided_slice %73 {offsets = [0, 0], sizes = [8, 64], strides = [1, 1]} : vector<8x128xf32> to vector<8x64xf32>
    %c354 = arith.constant 354 : index
    %c0_22 = arith.constant 0 : index
    %75 = vector.load %arg1[%c354, %c0_22] : memref<384x128xbf16, #tpu.memory_space<vmem>>, vector<1x64xbf16>
    %76 = arith.extf %75 : vector<1x64xbf16> to vector<1x64xf32>
    %77 = vector.broadcast %76 : vector<1x64xf32> to vector<8x64xf32>
    %78 = arith.addf %74, %77 : vector<8x64xf32>
    %c357 = arith.constant 357 : index
    %c0_23 = arith.constant 0 : index
    %79 = vector.load %arg1[%c357, %c0_23] : memref<384x128xbf16, #tpu.memory_space<vmem>>, vector<1x64xbf16>
    %80 = arith.extf %79 : vector<1x64xbf16> to vector<1x64xf32>
    %c360 = arith.constant 360 : index
    %c0_24 = arith.constant 0 : index
    %81 = vector.load %arg1[%c360, %c0_24] : memref<384x128xbf16, #tpu.memory_space<vmem>>, vector<1x64xbf16>
    %82 = arith.extf %81 : vector<1x64xbf16> to vector<1x64xf32>
    %cst_25 = arith.constant 0.000000e+00 : f32
    %83 = vector.broadcast %cst_25 : f32 to vector<8x64xf32>
    %84 = arith.select %9, %78, %83 : vector<8x64xi1>, vector<8x64xf32>
    %85 = arith.subf %78, %84 : vector<8x64xf32>
    %cst_26 = arith.constant dense<0.000000e+00> : vector<8xf32>
    %86 = vector.multi_reduction <add>, %84, %cst_26 [1] : vector<8x64xf32> to vector<8xf32>
    %87 = vector.shape_cast %86 : vector<8xf32> to vector<8x1xf32>
    %cst_27 = arith.constant dense<0.000000e+00> : vector<8xf32>
    %88 = vector.multi_reduction <add>, %85, %cst_27 [1] : vector<8x64xf32> to vector<8xf32>
    %89 = vector.shape_cast %88 : vector<8xf32> to vector<8x1xf32>
    %90 = vector.shape_cast %87 : vector<8x1xf32> to vector<8x1xf32>
    %91 = vector.broadcast %90 : vector<8x1xf32> to vector<8x64xf32>
    %92 = vector.shape_cast %89 : vector<8x1xf32> to vector<8x1xf32>
    %93 = vector.broadcast %92 : vector<8x1xf32> to vector<8x64xf32>
    %94 = arith.select %9, %91, %93 : vector<8x64xi1>, vector<8x64xf32>
    %cst_28 = arith.constant 3.125000e-02 : f32
    %95 = vector.broadcast %cst_28 : f32 to vector<8x64xf32>
    %96 = arith.mulf %94, %95 : vector<8x64xf32>
    %97 = arith.subf %78, %96 : vector<8x64xf32>
    %cst_29 = arith.constant 0.000000e+00 : f32
    %98 = vector.broadcast %cst_29 : f32 to vector<8x64xf32>
    %99 = arith.select %9, %97, %98 : vector<8x64xi1>, vector<8x64xf32>
    %100 = arith.subf %97, %99 : vector<8x64xf32>
    %101 = arith.mulf %99, %99 : vector<8x64xf32>
    %cst_30 = arith.constant dense<0.000000e+00> : vector<8xf32>
    %102 = vector.multi_reduction <add>, %101, %cst_30 [1] : vector<8x64xf32> to vector<8xf32>
    %103 = vector.shape_cast %102 : vector<8xf32> to vector<8x1xf32>
    %104 = arith.mulf %100, %100 : vector<8x64xf32>
    %cst_31 = arith.constant dense<0.000000e+00> : vector<8xf32>
    %105 = vector.multi_reduction <add>, %104, %cst_31 [1] : vector<8x64xf32> to vector<8xf32>
    %106 = vector.shape_cast %105 : vector<8xf32> to vector<8x1xf32>
    %107 = vector.shape_cast %103 : vector<8x1xf32> to vector<8x1xf32>
    %108 = vector.broadcast %107 : vector<8x1xf32> to vector<8x64xf32>
    %109 = vector.shape_cast %106 : vector<8x1xf32> to vector<8x1xf32>
    %110 = vector.broadcast %109 : vector<8x1xf32> to vector<8x64xf32>
    %111 = arith.select %9, %108, %110 : vector<8x64xi1>, vector<8x64xf32>
    %cst_32 = arith.constant 3.125000e-02 : f32
    %112 = vector.broadcast %cst_32 : f32 to vector<8x64xf32>
    %113 = arith.mulf %111, %112 : vector<8x64xf32>
    %cst_33 = arith.constant 9.99999974E-6 : f32
    %114 = vector.broadcast %cst_33 : f32 to vector<8x64xf32>
    %115 = arith.addf %113, %114 : vector<8x64xf32>
    %116 = math.rsqrt %115 : vector<8x64xf32>
    %117 = arith.mulf %97, %116 : vector<8x64xf32>
    %118 = vector.broadcast %80 : vector<1x64xf32> to vector<8x64xf32>
    %119 = arith.mulf %117, %118 : vector<8x64xf32>
    %120 = vector.broadcast %82 : vector<1x64xf32> to vector<8x64xf32>
    %121 = arith.addf %119, %120 : vector<8x64xf32>
    %cst_34 = arith.constant 0.000000e+00 : f32
    %122 = vector.broadcast %cst_34 : f32 to vector<8x64xf32>
    %123 = arith.cmpf ogt, %121, %122 : vector<8x64xf32>
    %cst_35 = arith.constant 0.00999999977 : f32
    %124 = vector.broadcast %cst_35 : f32 to vector<8x64xf32>
    %125 = arith.mulf %124, %121 : vector<8x64xf32>
    %126 = arith.select %123, %121, %125 : vector<8x64xi1>, vector<8x64xf32>
    %127 = arith.truncf %126 : vector<8x64xf32> to vector<8x64xbf16>
    %c64_36 = arith.constant 64 : index
    %c0_37 = arith.constant 0 : index
    %128 = vector.load %arg1[%c64_36, %c0_37] : memref<384x128xbf16, #tpu.memory_space<vmem>>, vector<64x128xbf16>
    %cst_38 = arith.constant dense<0.000000e+00> : vector<8x128xf32>
    %129 = tpu.matmul %127, %128, %cst_38 {dimension_numbers = #tpu.dot_dimension_numbers<[1], [0], [0], [1], [0, 0, 1, 1], [], []>} : vector<8x64xbf16>, vector<64x128xbf16>, vector<8x128xf32> -> vector<8x128xf32>
    %130 = vector.extract_strided_slice %129 {offsets = [0, 0], sizes = [8, 64], strides = [1, 1]} : vector<8x128xf32> to vector<8x64xf32>
    %c355 = arith.constant 355 : index
    %c0_39 = arith.constant 0 : index
    %131 = vector.load %arg1[%c355, %c0_39] : memref<384x128xbf16, #tpu.memory_space<vmem>>, vector<1x64xbf16>
    %132 = arith.extf %131 : vector<1x64xbf16> to vector<1x64xf32>
    %133 = vector.broadcast %132 : vector<1x64xf32> to vector<8x64xf32>
    %134 = arith.addf %130, %133 : vector<8x64xf32>
    %c358 = arith.constant 358 : index
    %c0_40 = arith.constant 0 : index
    %135 = vector.load %arg1[%c358, %c0_40] : memref<384x128xbf16, #tpu.memory_space<vmem>>, vector<1x64xbf16>
    %136 = arith.extf %135 : vector<1x64xbf16> to vector<1x64xf32>
    %c361 = arith.constant 361 : index
    %c0_41 = arith.constant 0 : index
    %137 = vector.load %arg1[%c361, %c0_41] : memref<384x128xbf16, #tpu.memory_space<vmem>>, vector<1x64xbf16>
    %138 = arith.extf %137 : vector<1x64xbf16> to vector<1x64xf32>
    %cst_42 = arith.constant 0.000000e+00 : f32
    %139 = vector.broadcast %cst_42 : f32 to vector<8x64xf32>
    %140 = arith.select %9, %134, %139 : vector<8x64xi1>, vector<8x64xf32>
    %141 = arith.subf %134, %140 : vector<8x64xf32>
    %cst_43 = arith.constant dense<0.000000e+00> : vector<8xf32>
    %142 = vector.multi_reduction <add>, %140, %cst_43 [1] : vector<8x64xf32> to vector<8xf32>
    %143 = vector.shape_cast %142 : vector<8xf32> to vector<8x1xf32>
    %cst_44 = arith.constant dense<0.000000e+00> : vector<8xf32>
    %144 = vector.multi_reduction <add>, %141, %cst_44 [1] : vector<8x64xf32> to vector<8xf32>
    %145 = vector.shape_cast %144 : vector<8xf32> to vector<8x1xf32>
    %146 = vector.shape_cast %143 : vector<8x1xf32> to vector<8x1xf32>
    %147 = vector.broadcast %146 : vector<8x1xf32> to vector<8x64xf32>
    %148 = vector.shape_cast %145 : vector<8x1xf32> to vector<8x1xf32>
    %149 = vector.broadcast %148 : vector<8x1xf32> to vector<8x64xf32>
    %150 = arith.select %9, %147, %149 : vector<8x64xi1>, vector<8x64xf32>
    %cst_45 = arith.constant 3.125000e-02 : f32
    %151 = vector.broadcast %cst_45 : f32 to vector<8x64xf32>
    %152 = arith.mulf %150, %151 : vector<8x64xf32>
    %153 = arith.subf %134, %152 : vector<8x64xf32>
    %cst_46 = arith.constant 0.000000e+00 : f32
    %154 = vector.broadcast %cst_46 : f32 to vector<8x64xf32>
    %155 = arith.select %9, %153, %154 : vector<8x64xi1>, vector<8x64xf32>
    %156 = arith.subf %153, %155 : vector<8x64xf32>
    %157 = arith.mulf %155, %155 : vector<8x64xf32>
    %cst_47 = arith.constant dense<0.000000e+00> : vector<8xf32>
    %158 = vector.multi_reduction <add>, %157, %cst_47 [1] : vector<8x64xf32> to vector<8xf32>
    %159 = vector.shape_cast %158 : vector<8xf32> to vector<8x1xf32>
    %160 = arith.mulf %156, %156 : vector<8x64xf32>
    %cst_48 = arith.constant dense<0.000000e+00> : vector<8xf32>
    %161 = vector.multi_reduction <add>, %160, %cst_48 [1] : vector<8x64xf32> to vector<8xf32>
    %162 = vector.shape_cast %161 : vector<8xf32> to vector<8x1xf32>
    %163 = vector.shape_cast %159 : vector<8x1xf32> to vector<8x1xf32>
    %164 = vector.broadcast %163 : vector<8x1xf32> to vector<8x64xf32>
    %165 = vector.shape_cast %162 : vector<8x1xf32> to vector<8x1xf32>
    %166 = vector.broadcast %165 : vector<8x1xf32> to vector<8x64xf32>
    %167 = arith.select %9, %164, %166 : vector<8x64xi1>, vector<8x64xf32>
    %cst_49 = arith.constant 3.125000e-02 : f32
    %168 = vector.broadcast %cst_49 : f32 to vector<8x64xf32>
    %169 = arith.mulf %167, %168 : vector<8x64xf32>
    %cst_50 = arith.constant 9.99999974E-6 : f32
    %170 = vector.broadcast %cst_50 : f32 to vector<8x64xf32>
    %171 = arith.addf %169, %170 : vector<8x64xf32>
    %172 = math.rsqrt %171 : vector<8x64xf32>
    %173 = arith.mulf %153, %172 : vector<8x64xf32>
    %174 = vector.broadcast %136 : vector<1x64xf32> to vector<8x64xf32>
    %175 = arith.mulf %173, %174 : vector<8x64xf32>
    %176 = vector.broadcast %138 : vector<1x64xf32> to vector<8x64xf32>
    %177 = arith.addf %175, %176 : vector<8x64xf32>
    %cst_51 = arith.constant 0.000000e+00 : f32
    %178 = vector.broadcast %cst_51 : f32 to vector<8x64xf32>
    %179 = arith.cmpf ogt, %177, %178 : vector<8x64xf32>
    %cst_52 = arith.constant 0.00999999977 : f32
    %180 = vector.broadcast %cst_52 : f32 to vector<8x64xf32>
    %181 = arith.mulf %180, %177 : vector<8x64xf32>
    %182 = arith.select %179, %177, %181 : vector<8x64xi1>, vector<8x64xf32>
    %183 = arith.truncf %182 : vector<8x64xf32> to vector<8x64xbf16>
    %c128 = arith.constant 128 : index
    %c0_53 = arith.constant 0 : index
    %184 = vector.load %arg1[%c128, %c0_53] : memref<384x128xbf16, #tpu.memory_space<vmem>>, vector<64x128xbf16>
    %cst_54 = arith.constant dense<0.000000e+00> : vector<8x128xf32>
    %185 = tpu.matmul %183, %184, %cst_54 {dimension_numbers = #tpu.dot_dimension_numbers<[1], [0], [0], [1], [0, 0, 1, 1], [], []>} : vector<8x64xbf16>, vector<64x128xbf16>, vector<8x128xf32> -> vector<8x128xf32>
    %c362 = arith.constant 362 : index
    %c0_55 = arith.constant 0 : index
    %186 = vector.load %arg1[%c362, %c0_55] : memref<384x128xbf16, #tpu.memory_space<vmem>>, vector<1x128xbf16>
    %187 = arith.extf %186 : vector<1x128xbf16> to vector<1x128xf32>
    %188 = vector.broadcast %187 : vector<1x128xf32> to vector<8x128xf32>
    %189 = arith.addf %185, %188 : vector<8x128xf32>
    %c192 = arith.constant 192 : index
    %c0_56 = arith.constant 0 : index
    %190 = vector.load %arg1[%c192, %c0_56] : memref<384x128xbf16, #tpu.memory_space<vmem>>, vector<32x128xbf16>
    %c363 = arith.constant 363 : index
    %c0_57 = arith.constant 0 : index
    %191 = vector.load %arg1[%c363, %c0_57] : memref<384x128xbf16, #tpu.memory_space<vmem>>, vector<1x128xbf16>
    %192 = arith.extf %191 : vector<1x128xbf16> to vector<1x128xf32>
    %193 = vector.extract_strided_slice %189 {offsets = [0, 0], sizes = [1, 128], strides = [1, 1]} : vector<8x128xf32> to vector<1x128xf32>
    %194 = arith.truncf %6 : vector<1x32xf32> to vector<1x32xbf16>
    %cst_58 = arith.constant dense<0.000000e+00> : vector<1x128xf32>
    %195 = tpu.matmul %194, %190, %cst_58 {dimension_numbers = #tpu.dot_dimension_numbers<[1], [0], [0], [1], [0, 0, 1, 1], [], []>} : vector<1x32xbf16>, vector<32x128xbf16>, vector<1x128xf32> -> vector<1x128xf32>
    %196 = arith.addf %195, %192 : vector<1x128xf32>
    %197 = vector.extract_strided_slice %193 {offsets = [0, 0], sizes = [1, 64], strides = [1, 1]} : vector<1x128xf32> to vector<1x64xf32>
    %198 = vector.extract_strided_slice %196 {offsets = [0, 0], sizes = [1, 64], strides = [1, 1]} : vector<1x128xf32> to vector<1x64xf32>
    %199 = arith.addf %197, %198 : vector<1x64xf32>
    %200 = arith.negf %199 : vector<1x64xf32>
    %201 = math.exp %200 : vector<1x64xf32>
    %cst_59 = arith.constant 1.000000e+00 : f32
    %202 = vector.broadcast %cst_59 : f32 to vector<1x64xf32>
    %203 = arith.addf %202, %201 : vector<1x64xf32>
    %204 = arith.divf %202, %203 : vector<1x64xf32>
    %205 = vector.extract_strided_slice %204 {offsets = [0, 0], sizes = [1, 32], strides = [1, 1]} : vector<1x64xf32> to vector<1x32xf32>
    %206 = vector.extract_strided_slice %204 {offsets = [0, 32], sizes = [1, 32], strides = [1, 1]} : vector<1x64xf32> to vector<1x32xf32>
    %207 = vector.extract_strided_slice %193 {offsets = [0, 64], sizes = [1, 32], strides = [1, 1]} : vector<1x128xf32> to vector<1x32xf32>
    %208 = vector.extract_strided_slice %196 {offsets = [0, 64], sizes = [1, 32], strides = [1, 1]} : vector<1x128xf32> to vector<1x32xf32>
    %209 = arith.mulf %205, %208 : vector<1x32xf32>
    %210 = arith.addf %207, %209 : vector<1x32xf32>
    %211 = math.tanh %210 : vector<1x32xf32>
    %cst_60 = arith.constant 1.000000e+00 : f32
    %212 = vector.broadcast %cst_60 : f32 to vector<1x32xf32>
    %213 = arith.subf %212, %206 : vector<1x32xf32>
    %214 = arith.mulf %213, %211 : vector<1x32xf32>
    %215 = arith.mulf %206, %6 : vector<1x32xf32>
    %216 = arith.addf %214, %215 : vector<1x32xf32>
    %c0_61 = arith.constant 0 : index
    %c0_62 = arith.constant 0 : index
    %217 = vector.load %arg3[%c0_61, %c0_62] : memref<8x32xf32, #tpu.memory_space<vmem>>, vector<1x32xf32>
    tpu.vector_store %arg3[%c0_61, %c0_62], %216 {strides = array<i32>} : memref<8x32xf32, #tpu.memory_space<vmem>>, vector<1x32xf32>,
    %218 = vector.extract_strided_slice %189 {offsets = [1, 0], sizes = [1, 128], strides = [1, 1]} : vector<8x128xf32> to vector<1x128xf32>
    %219 = arith.truncf %216 : vector<1x32xf32> to vector<1x32xbf16>
    %cst_63 = arith.constant dense<0.000000e+00> : vector<1x128xf32>
    %220 = tpu.matmul %219, %190, %cst_63 {dimension_numbers = #tpu.dot_dimension_numbers<[1], [0], [0], [1], [0, 0, 1, 1], [], []>} : vector<1x32xbf16>, vector<32x128xbf16>, vector<1x128xf32> -> vector<1x128xf32>
    %221 = arith.addf %220, %192 : vector<1x128xf32>
    %222 = vector.extract_strided_slice %218 {offsets = [0, 0], sizes = [1, 64], strides = [1, 1]} : vector<1x128xf32> to vector<1x64xf32>
    %223 = vector.extract_strided_slice %221 {offsets = [0, 0], sizes = [1, 64], strides = [1, 1]} : vector<1x128xf32> to vector<1x64xf32>
    %224 = arith.addf %222, %223 : vector<1x64xf32>
    %225 = arith.negf %224 : vector<1x64xf32>
    %226 = math.exp %225 : vector<1x64xf32>
    %cst_64 = arith.constant 1.000000e+00 : f32
    %227 = vector.broadcast %cst_64 : f32 to vector<1x64xf32>
    %228 = arith.addf %227, %226 : vector<1x64xf32>
    %229 = arith.divf %227, %228 : vector<1x64xf32>
    %230 = vector.extract_strided_slice %229 {offsets = [0, 0], sizes = [1, 32], strides = [1, 1]} : vector<1x64xf32> to vector<1x32xf32>
    %231 = vector.extract_strided_slice %229 {offsets = [0, 32], sizes = [1, 32], strides = [1, 1]} : vector<1x64xf32> to vector<1x32xf32>
    %232 = vector.extract_strided_slice %218 {offsets = [0, 64], sizes = [1, 32], strides = [1, 1]} : vector<1x128xf32> to vector<1x32xf32>
    %233 = vector.extract_strided_slice %221 {offsets = [0, 64], sizes = [1, 32], strides = [1, 1]} : vector<1x128xf32> to vector<1x32xf32>
    %234 = arith.mulf %230, %233 : vector<1x32xf32>
    %235 = arith.addf %232, %234 : vector<1x32xf32>
    %236 = math.tanh %235 : vector<1x32xf32>
    %cst_65 = arith.constant 1.000000e+00 : f32
    %237 = vector.broadcast %cst_65 : f32 to vector<1x32xf32>
    %238 = arith.subf %237, %231 : vector<1x32xf32>
    %239 = arith.mulf %238, %236 : vector<1x32xf32>
    %240 = arith.mulf %231, %216 : vector<1x32xf32>
    %241 = arith.addf %239, %240 : vector<1x32xf32>
    %c1_66 = arith.constant 1 : index
    %c0_67 = arith.constant 0 : index
    %242 = vector.load %arg3[%c1_66, %c0_67] : memref<8x32xf32, #tpu.memory_space<vmem>>, vector<1x32xf32>
    tpu.vector_store %arg3[%c1_66, %c0_67], %241 {strides = array<i32>} : memref<8x32xf32, #tpu.memory_space<vmem>>, vector<1x32xf32>,
    %243 = vector.extract_strided_slice %189 {offsets = [2, 0], sizes = [1, 128], strides = [1, 1]} : vector<8x128xf32> to vector<1x128xf32>
    %244 = arith.truncf %241 : vector<1x32xf32> to vector<1x32xbf16>
    %cst_68 = arith.constant dense<0.000000e+00> : vector<1x128xf32>
    %245 = tpu.matmul %244, %190, %cst_68 {dimension_numbers = #tpu.dot_dimension_numbers<[1], [0], [0], [1], [0, 0, 1, 1], [], []>} : vector<1x32xbf16>, vector<32x128xbf16>, vector<1x128xf32> -> vector<1x128xf32>
    %246 = arith.addf %245, %192 : vector<1x128xf32>
    %247 = vector.extract_strided_slice %243 {offsets = [0, 0], sizes = [1, 64], strides = [1, 1]} : vector<1x128xf32> to vector<1x64xf32>
    %248 = vector.extract_strided_slice %246 {offsets = [0, 0], sizes = [1, 64], strides = [1, 1]} : vector<1x128xf32> to vector<1x64xf32>
    %249 = arith.addf %247, %248 : vector<1x64xf32>
    %250 = arith.negf %249 : vector<1x64xf32>
    %251 = math.exp %250 : vector<1x64xf32>
    %cst_69 = arith.constant 1.000000e+00 : f32
    %252 = vector.broadcast %cst_69 : f32 to vector<1x64xf32>
    %253 = arith.addf %252, %251 : vector<1x64xf32>
    %254 = arith.divf %252, %253 : vector<1x64xf32>
    %255 = vector.extract_strided_slice %254 {offsets = [0, 0], sizes = [1, 32], strides = [1, 1]} : vector<1x64xf32> to vector<1x32xf32>
    %256 = vector.extract_strided_slice %254 {offsets = [0, 32], sizes = [1, 32], strides = [1, 1]} : vector<1x64xf32> to vector<1x32xf32>
    %257 = vector.extract_strided_slice %243 {offsets = [0, 64], sizes = [1, 32], strides = [1, 1]} : vector<1x128xf32> to vector<1x32xf32>
    %258 = vector.extract_strided_slice %246 {offsets = [0, 64], sizes = [1, 32], strides = [1, 1]} : vector<1x128xf32> to vector<1x32xf32>
    %259 = arith.mulf %255, %258 : vector<1x32xf32>
    %260 = arith.addf %257, %259 : vector<1x32xf32>
    %261 = math.tanh %260 : vector<1x32xf32>
    %cst_70 = arith.constant 1.000000e+00 : f32
    %262 = vector.broadcast %cst_70 : f32 to vector<1x32xf32>
    %263 = arith.subf %262, %256 : vector<1x32xf32>
    %264 = arith.mulf %263, %261 : vector<1x32xf32>
    %265 = arith.mulf %256, %241 : vector<1x32xf32>
    %266 = arith.addf %264, %265 : vector<1x32xf32>
    %c2 = arith.constant 2 : index
    %c0_71 = arith.constant 0 : index
    %267 = vector.load %arg3[%c2, %c0_71] : memref<8x32xf32, #tpu.memory_space<vmem>>, vector<1x32xf32>
    tpu.vector_store %arg3[%c2, %c0_71], %266 {strides = array<i32>} : memref<8x32xf32, #tpu.memory_space<vmem>>, vector<1x32xf32>,
    %268 = vector.extract_strided_slice %189 {offsets = [3, 0], sizes = [1, 128], strides = [1, 1]} : vector<8x128xf32> to vector<1x128xf32>
    %269 = arith.truncf %266 : vector<1x32xf32> to vector<1x32xbf16>
    %cst_72 = arith.constant dense<0.000000e+00> : vector<1x128xf32>
    %270 = tpu.matmul %269, %190, %cst_72 {dimension_numbers = #tpu.dot_dimension_numbers<[1], [0], [0], [1], [0, 0, 1, 1], [], []>} : vector<1x32xbf16>, vector<32x128xbf16>, vector<1x128xf32> -> vector<1x128xf32>
    %271 = arith.addf %270, %192 : vector<1x128xf32>
    %272 = vector.extract_strided_slice %268 {offsets = [0, 0], sizes = [1, 64], strides = [1, 1]} : vector<1x128xf32> to vector<1x64xf32>
    %273 = vector.extract_strided_slice %271 {offsets = [0, 0], sizes = [1, 64], strides = [1, 1]} : vector<1x128xf32> to vector<1x64xf32>
    %274 = arith.addf %272, %273 : vector<1x64xf32>
    %275 = arith.negf %274 : vector<1x64xf32>
    %276 = math.exp %275 : vector<1x64xf32>
    %cst_73 = arith.constant 1.000000e+00 : f32
    %277 = vector.broadcast %cst_73 : f32 to vector<1x64xf32>
    %278 = arith.addf %277, %276 : vector<1x64xf32>
    %279 = arith.divf %277, %278 : vector<1x64xf32>
    %280 = vector.extract_strided_slice %279 {offsets = [0, 0], sizes = [1, 32], strides = [1, 1]} : vector<1x64xf32> to vector<1x32xf32>
    %281 = vector.extract_strided_slice %279 {offsets = [0, 32], sizes = [1, 32], strides = [1, 1]} : vector<1x64xf32> to vector<1x32xf32>
    %282 = vector.extract_strided_slice %268 {offsets = [0, 64], sizes = [1, 32], strides = [1, 1]} : vector<1x128xf32> to vector<1x32xf32>
    %283 = vector.extract_strided_slice %271 {offsets = [0, 64], sizes = [1, 32], strides = [1, 1]} : vector<1x128xf32> to vector<1x32xf32>
    %284 = arith.mulf %280, %283 : vector<1x32xf32>
    %285 = arith.addf %282, %284 : vector<1x32xf32>
    %286 = math.tanh %285 : vector<1x32xf32>
    %cst_74 = arith.constant 1.000000e+00 : f32
    %287 = vector.broadcast %cst_74 : f32 to vector<1x32xf32>
    %288 = arith.subf %287, %281 : vector<1x32xf32>
    %289 = arith.mulf %288, %286 : vector<1x32xf32>
    %290 = arith.mulf %281, %266 : vector<1x32xf32>
    %291 = arith.addf %289, %290 : vector<1x32xf32>
    %c3 = arith.constant 3 : index
    %c0_75 = arith.constant 0 : index
    %292 = vector.load %arg3[%c3, %c0_75] : memref<8x32xf32, #tpu.memory_space<vmem>>, vector<1x32xf32>
    tpu.vector_store %arg3[%c3, %c0_75], %291 {strides = array<i32>} : memref<8x32xf32, #tpu.memory_space<vmem>>, vector<1x32xf32>,
    %293 = vector.extract_strided_slice %189 {offsets = [4, 0], sizes = [1, 128], strides = [1, 1]} : vector<8x128xf32> to vector<1x128xf32>
    %294 = arith.truncf %291 : vector<1x32xf32> to vector<1x32xbf16>
    %cst_76 = arith.constant dense<0.000000e+00> : vector<1x128xf32>
    %295 = tpu.matmul %294, %190, %cst_76 {dimension_numbers = #tpu.dot_dimension_numbers<[1], [0], [0], [1], [0, 0, 1, 1], [], []>} : vector<1x32xbf16>, vector<32x128xbf16>, vector<1x128xf32> -> vector<1x128xf32>
    %296 = arith.addf %295, %192 : vector<1x128xf32>
    %297 = vector.extract_strided_slice %293 {offsets = [0, 0], sizes = [1, 64], strides = [1, 1]} : vector<1x128xf32> to vector<1x64xf32>
    %298 = vector.extract_strided_slice %296 {offsets = [0, 0], sizes = [1, 64], strides = [1, 1]} : vector<1x128xf32> to vector<1x64xf32>
    %299 = arith.addf %297, %298 : vector<1x64xf32>
    %300 = arith.negf %299 : vector<1x64xf32>
    %301 = math.exp %300 : vector<1x64xf32>
    %cst_77 = arith.constant 1.000000e+00 : f32
    %302 = vector.broadcast %cst_77 : f32 to vector<1x64xf32>
    %303 = arith.addf %302, %301 : vector<1x64xf32>
    %304 = arith.divf %302, %303 : vector<1x64xf32>
    %305 = vector.extract_strided_slice %304 {offsets = [0, 0], sizes = [1, 32], strides = [1, 1]} : vector<1x64xf32> to vector<1x32xf32>
    %306 = vector.extract_strided_slice %304 {offsets = [0, 32], sizes = [1, 32], strides = [1, 1]} : vector<1x64xf32> to vector<1x32xf32>
    %307 = vector.extract_strided_slice %293 {offsets = [0, 64], sizes = [1, 32], strides = [1, 1]} : vector<1x128xf32> to vector<1x32xf32>
    %308 = vector.extract_strided_slice %296 {offsets = [0, 64], sizes = [1, 32], strides = [1, 1]} : vector<1x128xf32> to vector<1x32xf32>
    %309 = arith.mulf %305, %308 : vector<1x32xf32>
    %310 = arith.addf %307, %309 : vector<1x32xf32>
    %311 = math.tanh %310 : vector<1x32xf32>
    %cst_78 = arith.constant 1.000000e+00 : f32
    %312 = vector.broadcast %cst_78 : f32 to vector<1x32xf32>
    %313 = arith.subf %312, %306 : vector<1x32xf32>
    %314 = arith.mulf %313, %311 : vector<1x32xf32>
    %315 = arith.mulf %306, %291 : vector<1x32xf32>
    %316 = arith.addf %314, %315 : vector<1x32xf32>
    %c4 = arith.constant 4 : index
    %c0_79 = arith.constant 0 : index
    %317 = vector.load %arg3[%c4, %c0_79] : memref<8x32xf32, #tpu.memory_space<vmem>>, vector<1x32xf32>
    tpu.vector_store %arg3[%c4, %c0_79], %316 {strides = array<i32>} : memref<8x32xf32, #tpu.memory_space<vmem>>, vector<1x32xf32>,
    %318 = vector.extract_strided_slice %189 {offsets = [5, 0], sizes = [1, 128], strides = [1, 1]} : vector<8x128xf32> to vector<1x128xf32>
    %319 = arith.truncf %316 : vector<1x32xf32> to vector<1x32xbf16>
    %cst_80 = arith.constant dense<0.000000e+00> : vector<1x128xf32>
    %320 = tpu.matmul %319, %190, %cst_80 {dimension_numbers = #tpu.dot_dimension_numbers<[1], [0], [0], [1], [0, 0, 1, 1], [], []>} : vector<1x32xbf16>, vector<32x128xbf16>, vector<1x128xf32> -> vector<1x128xf32>
    %321 = arith.addf %320, %192 : vector<1x128xf32>
    %322 = vector.extract_strided_slice %318 {offsets = [0, 0], sizes = [1, 64], strides = [1, 1]} : vector<1x128xf32> to vector<1x64xf32>
    %323 = vector.extract_strided_slice %321 {offsets = [0, 0], sizes = [1, 64], strides = [1, 1]} : vector<1x128xf32> to vector<1x64xf32>
    %324 = arith.addf %322, %323 : vector<1x64xf32>
    %325 = arith.negf %324 : vector<1x64xf32>
    %326 = math.exp %325 : vector<1x64xf32>
    %cst_81 = arith.constant 1.000000e+00 : f32
    %327 = vector.broadcast %cst_81 : f32 to vector<1x64xf32>
    %328 = arith.addf %327, %326 : vector<1x64xf32>
    %329 = arith.divf %327, %328 : vector<1x64xf32>
    %330 = vector.extract_strided_slice %329 {offsets = [0, 0], sizes = [1, 32], strides = [1, 1]} : vector<1x64xf32> to vector<1x32xf32>
    %331 = vector.extract_strided_slice %329 {offsets = [0, 32], sizes = [1, 32], strides = [1, 1]} : vector<1x64xf32> to vector<1x32xf32>
    %332 = vector.extract_strided_slice %318 {offsets = [0, 64], sizes = [1, 32], strides = [1, 1]} : vector<1x128xf32> to vector<1x32xf32>
    %333 = vector.extract_strided_slice %321 {offsets = [0, 64], sizes = [1, 32], strides = [1, 1]} : vector<1x128xf32> to vector<1x32xf32>
    %334 = arith.mulf %330, %333 : vector<1x32xf32>
    %335 = arith.addf %332, %334 : vector<1x32xf32>
    %336 = math.tanh %335 : vector<1x32xf32>
    %cst_82 = arith.constant 1.000000e+00 : f32
    %337 = vector.broadcast %cst_82 : f32 to vector<1x32xf32>
    %338 = arith.subf %337, %331 : vector<1x32xf32>
    %339 = arith.mulf %338, %336 : vector<1x32xf32>
    %340 = arith.mulf %331, %316 : vector<1x32xf32>
    %341 = arith.addf %339, %340 : vector<1x32xf32>
    %c5 = arith.constant 5 : index
    %c0_83 = arith.constant 0 : index
    %342 = vector.load %arg3[%c5, %c0_83] : memref<8x32xf32, #tpu.memory_space<vmem>>, vector<1x32xf32>
    tpu.vector_store %arg3[%c5, %c0_83], %341 {strides = array<i32>} : memref<8x32xf32, #tpu.memory_space<vmem>>, vector<1x32xf32>,
    %343 = vector.extract_strided_slice %189 {offsets = [6, 0], sizes = [1, 128], strides = [1, 1]} : vector<8x128xf32> to vector<1x128xf32>
    %344 = arith.truncf %341 : vector<1x32xf32> to vector<1x32xbf16>
    %cst_84 = arith.constant dense<0.000000e+00> : vector<1x128xf32>
    %345 = tpu.matmul %344, %190, %cst_84 {dimension_numbers = #tpu.dot_dimension_numbers<[1], [0], [0], [1], [0, 0, 1, 1], [], []>} : vector<1x32xbf16>, vector<32x128xbf16>, vector<1x128xf32> -> vector<1x128xf32>
    %346 = arith.addf %345, %192 : vector<1x128xf32>
    %347 = vector.extract_strided_slice %343 {offsets = [0, 0], sizes = [1, 64], strides = [1, 1]} : vector<1x128xf32> to vector<1x64xf32>
    %348 = vector.extract_strided_slice %346 {offsets = [0, 0], sizes = [1, 64], strides = [1, 1]} : vector<1x128xf32> to vector<1x64xf32>
    %349 = arith.addf %347, %348 : vector<1x64xf32>
    %350 = arith.negf %349 : vector<1x64xf32>
    %351 = math.exp %350 : vector<1x64xf32>
    %cst_85 = arith.constant 1.000000e+00 : f32
    %352 = vector.broadcast %cst_85 : f32 to vector<1x64xf32>
    %353 = arith.addf %352, %351 : vector<1x64xf32>
    %354 = arith.divf %352, %353 : vector<1x64xf32>
    %355 = vector.extract_strided_slice %354 {offsets = [0, 0], sizes = [1, 32], strides = [1, 1]} : vector<1x64xf32> to vector<1x32xf32>
    %356 = vector.extract_strided_slice %354 {offsets = [0, 32], sizes = [1, 32], strides = [1, 1]} : vector<1x64xf32> to vector<1x32xf32>
    %357 = vector.extract_strided_slice %343 {offsets = [0, 64], sizes = [1, 32], strides = [1, 1]} : vector<1x128xf32> to vector<1x32xf32>
    %358 = vector.extract_strided_slice %346 {offsets = [0, 64], sizes = [1, 32], strides = [1, 1]} : vector<1x128xf32> to vector<1x32xf32>
    %359 = arith.mulf %355, %358 : vector<1x32xf32>
    %360 = arith.addf %357, %359 : vector<1x32xf32>
    %361 = math.tanh %360 : vector<1x32xf32>
    %cst_86 = arith.constant 1.000000e+00 : f32
    %362 = vector.broadcast %cst_86 : f32 to vector<1x32xf32>
    %363 = arith.subf %362, %356 : vector<1x32xf32>
    %364 = arith.mulf %363, %361 : vector<1x32xf32>
    %365 = arith.mulf %356, %341 : vector<1x32xf32>
    %366 = arith.addf %364, %365 : vector<1x32xf32>
    %c6 = arith.constant 6 : index
    %c0_87 = arith.constant 0 : index
    %367 = vector.load %arg3[%c6, %c0_87] : memref<8x32xf32, #tpu.memory_space<vmem>>, vector<1x32xf32>
    tpu.vector_store %arg3[%c6, %c0_87], %366 {strides = array<i32>} : memref<8x32xf32, #tpu.memory_space<vmem>>, vector<1x32xf32>,
    %368 = vector.extract_strided_slice %189 {offsets = [7, 0], sizes = [1, 128], strides = [1, 1]} : vector<8x128xf32> to vector<1x128xf32>
    %369 = arith.truncf %366 : vector<1x32xf32> to vector<1x32xbf16>
    %cst_88 = arith.constant dense<0.000000e+00> : vector<1x128xf32>
    %370 = tpu.matmul %369, %190, %cst_88 {dimension_numbers = #tpu.dot_dimension_numbers<[1], [0], [0], [1], [0, 0, 1, 1], [], []>} : vector<1x32xbf16>, vector<32x128xbf16>, vector<1x128xf32> -> vector<1x128xf32>
    %371 = arith.addf %370, %192 : vector<1x128xf32>
    %372 = vector.extract_strided_slice %368 {offsets = [0, 0], sizes = [1, 64], strides = [1, 1]} : vector<1x128xf32> to vector<1x64xf32>
    %373 = vector.extract_strided_slice %371 {offsets = [0, 0], sizes = [1, 64], strides = [1, 1]} : vector<1x128xf32> to vector<1x64xf32>
    %374 = arith.addf %372, %373 : vector<1x64xf32>
    %375 = arith.negf %374 : vector<1x64xf32>
    %376 = math.exp %375 : vector<1x64xf32>
    %cst_89 = arith.constant 1.000000e+00 : f32
    %377 = vector.broadcast %cst_89 : f32 to vector<1x64xf32>
    %378 = arith.addf %377, %376 : vector<1x64xf32>
    %379 = arith.divf %377, %378 : vector<1x64xf32>
    %380 = vector.extract_strided_slice %379 {offsets = [0, 0], sizes = [1, 32], strides = [1, 1]} : vector<1x64xf32> to vector<1x32xf32>
    %381 = vector.extract_strided_slice %379 {offsets = [0, 32], sizes = [1, 32], strides = [1, 1]} : vector<1x64xf32> to vector<1x32xf32>
    %382 = vector.extract_strided_slice %368 {offsets = [0, 64], sizes = [1, 32], strides = [1, 1]} : vector<1x128xf32> to vector<1x32xf32>
    %383 = vector.extract_strided_slice %371 {offsets = [0, 64], sizes = [1, 32], strides = [1, 1]} : vector<1x128xf32> to vector<1x32xf32>
    %384 = arith.mulf %380, %383 : vector<1x32xf32>
    %385 = arith.addf %382, %384 : vector<1x32xf32>
    %386 = math.tanh %385 : vector<1x32xf32>
    %cst_90 = arith.constant 1.000000e+00 : f32
    %387 = vector.broadcast %cst_90 : f32 to vector<1x32xf32>
    %388 = arith.subf %387, %381 : vector<1x32xf32>
    %389 = arith.mulf %388, %386 : vector<1x32xf32>
    %390 = arith.mulf %381, %366 : vector<1x32xf32>
    %391 = arith.addf %389, %390 : vector<1x32xf32>
    %c7 = arith.constant 7 : index
    %c0_91 = arith.constant 0 : index
    %392 = vector.load %arg3[%c7, %c0_91] : memref<8x32xf32, #tpu.memory_space<vmem>>, vector<1x32xf32>
    tpu.vector_store %arg3[%c7, %c0_91], %391 {strides = array<i32>} : memref<8x32xf32, #tpu.memory_space<vmem>>, vector<1x32xf32>,
    %c0_92 = arith.constant 0 : index
    %c0_93 = arith.constant 0 : index
    %393 = vector.load %arg3[%c0_92, %c0_93] : memref<8x32xf32, #tpu.memory_space<vmem>>, vector<8x32xf32>
    %394 = arith.truncf %393 : vector<8x32xf32> to vector<8x32xbf16>
    %c224 = arith.constant 224 : index
    %c0_94 = arith.constant 0 : index
    %395 = vector.load %arg1[%c224, %c0_94] : memref<384x128xbf16, #tpu.memory_space<vmem>>, vector<32x128xbf16>
    %cst_95 = arith.constant dense<0.000000e+00> : vector<8x128xf32>
    %396 = tpu.matmul %394, %395, %cst_95 {dimension_numbers = #tpu.dot_dimension_numbers<[1], [0], [0], [1], [0, 0, 1, 1], [], []>} : vector<8x32xbf16>, vector<32x128xbf16>, vector<8x128xf32> -> vector<8x128xf32>
    %397 = vector.extract_strided_slice %396 {offsets = [0, 0], sizes = [8, 32], strides = [1, 1]} : vector<8x128xf32> to vector<8x32xf32>
    %c364 = arith.constant 364 : index
    %c0_96 = arith.constant 0 : index
    %398 = vector.load %arg1[%c364, %c0_96] : memref<384x128xbf16, #tpu.memory_space<vmem>>, vector<1x32xbf16>
    %399 = arith.extf %398 : vector<1x32xbf16> to vector<1x32xf32>
    %400 = vector.broadcast %0 : vector<8x1xf32> to vector<8x32xf32>
    %401 = vector.broadcast %399 : vector<1x32xf32> to vector<8x32xf32>
    %402 = arith.mulf %400, %401 : vector<8x32xf32>
    %403 = arith.addf %397, %402 : vector<8x32xf32>
    %c365 = arith.constant 365 : index
    %c0_97 = arith.constant 0 : index
    %404 = vector.load %arg1[%c365, %c0_97] : memref<384x128xbf16, #tpu.memory_space<vmem>>, vector<1x32xbf16>
    %405 = arith.extf %404 : vector<1x32xbf16> to vector<1x32xf32>
    %406 = vector.broadcast %5 : vector<8x1xf32> to vector<8x32xf32>
    %407 = vector.broadcast %405 : vector<1x32xf32> to vector<8x32xf32>
    %408 = arith.mulf %406, %407 : vector<8x32xf32>
    %409 = arith.addf %403, %408 : vector<8x32xf32>
    %c366 = arith.constant 366 : index
    %c0_98 = arith.constant 0 : index
    %410 = vector.load %arg1[%c366, %c0_98] : memref<384x128xbf16, #tpu.memory_space<vmem>>, vector<1x32xbf16>
    %411 = arith.extf %410 : vector<1x32xbf16> to vector<1x32xf32>
    %412 = vector.broadcast %411 : vector<1x32xf32> to vector<8x32xf32>
    %413 = arith.addf %409, %412 : vector<8x32xf32>
    %c369 = arith.constant 369 : index
    %c0_99 = arith.constant 0 : index
    %414 = vector.load %arg1[%c369, %c0_99] : memref<384x128xbf16, #tpu.memory_space<vmem>>, vector<1x32xbf16>
    %415 = arith.extf %414 : vector<1x32xbf16> to vector<1x32xf32>
    %c372 = arith.constant 372 : index
    %c0_100 = arith.constant 0 : index
    %416 = vector.load %arg1[%c372, %c0_100] : memref<384x128xbf16, #tpu.memory_space<vmem>>, vector<1x32xbf16>
    %417 = arith.extf %416 : vector<1x32xbf16> to vector<1x32xf32>
    %cst_101 = arith.constant dense<0.000000e+00> : vector<8xf32>
    %418 = vector.multi_reduction <add>, %413, %cst_101 [1] : vector<8x32xf32> to vector<8xf32>
    %419 = vector.shape_cast %418 : vector<8xf32> to vector<8x1xf32>
    %cst_102 = arith.constant 3.200000e+01 : f32
    %420 = vector.broadcast %cst_102 : f32 to vector<8x1xf32>
    %421 = arith.divf %419, %420 : vector<8x1xf32>
    %422 = vector.broadcast %421 : vector<8x1xf32> to vector<8x32xf32>
    %423 = arith.subf %413, %422 : vector<8x32xf32>
    %424 = arith.mulf %423, %423 : vector<8x32xf32>
    %cst_103 = arith.constant dense<0.000000e+00> : vector<8xf32>
    %425 = vector.multi_reduction <add>, %424, %cst_103 [1] : vector<8x32xf32> to vector<8xf32>
    %426 = vector.shape_cast %425 : vector<8xf32> to vector<8x1xf32>
    %cst_104 = arith.constant 3.200000e+01 : f32
    %427 = vector.broadcast %cst_104 : f32 to vector<8x1xf32>
    %428 = arith.divf %426, %427 : vector<8x1xf32>
    %429 = vector.broadcast %421 : vector<8x1xf32> to vector<8x32xf32>
    %430 = arith.subf %413, %429 : vector<8x32xf32>
    %cst_105 = arith.constant 9.99999974E-6 : f32
    %431 = vector.broadcast %cst_105 : f32 to vector<8x1xf32>
    %432 = arith.addf %428, %431 : vector<8x1xf32>
    %433 = math.rsqrt %432 : vector<8x1xf32>
    %434 = vector.broadcast %433 : vector<8x1xf32> to vector<8x32xf32>
    %435 = arith.mulf %430, %434 : vector<8x32xf32>
    %436 = vector.broadcast %415 : vector<1x32xf32> to vector<8x32xf32>
    %437 = arith.mulf %435, %436 : vector<8x32xf32>
    %438 = vector.broadcast %417 : vector<1x32xf32> to vector<8x32xf32>
    %439 = arith.addf %437, %438 : vector<8x32xf32>
    %cst_106 = arith.constant 0.000000e+00 : f32
    %440 = vector.broadcast %cst_106 : f32 to vector<8x32xf32>
    %441 = arith.cmpf ogt, %439, %440 : vector<8x32xf32>
    %cst_107 = arith.constant 0.00999999977 : f32
    %442 = vector.broadcast %cst_107 : f32 to vector<8x32xf32>
    %443 = arith.mulf %442, %439 : vector<8x32xf32>
    %444 = arith.select %441, %439, %443 : vector<8x32xi1>, vector<8x32xf32>
    %445 = arith.truncf %444 : vector<8x32xf32> to vector<8x32xbf16>
    %c256 = arith.constant 256 : index
    %c0_108 = arith.constant 0 : index
    %446 = vector.load %arg1[%c256, %c0_108] : memref<384x128xbf16, #tpu.memory_space<vmem>>, vector<32x128xbf16>
    %cst_109 = arith.constant dense<0.000000e+00> : vector<8x128xf32>
    %447 = tpu.matmul %445, %446, %cst_109 {dimension_numbers = #tpu.dot_dimension_numbers<[1], [0], [0], [1], [0, 0, 1, 1], [], []>} : vector<8x32xbf16>, vector<32x128xbf16>, vector<8x128xf32> -> vector<8x128xf32>
    %448 = vector.extract_strided_slice %447 {offsets = [0, 0], sizes = [8, 32], strides = [1, 1]} : vector<8x128xf32> to vector<8x32xf32>
    %c367 = arith.constant 367 : index
    %c0_110 = arith.constant 0 : index
    %449 = vector.load %arg1[%c367, %c0_110] : memref<384x128xbf16, #tpu.memory_space<vmem>>, vector<1x32xbf16>
    %450 = arith.extf %449 : vector<1x32xbf16> to vector<1x32xf32>
    %451 = vector.broadcast %450 : vector<1x32xf32> to vector<8x32xf32>
    %452 = arith.addf %448, %451 : vector<8x32xf32>
    %c370 = arith.constant 370 : index
    %c0_111 = arith.constant 0 : index
    %453 = vector.load %arg1[%c370, %c0_111] : memref<384x128xbf16, #tpu.memory_space<vmem>>, vector<1x32xbf16>
    %454 = arith.extf %453 : vector<1x32xbf16> to vector<1x32xf32>
    %c373 = arith.constant 373 : index
    %c0_112 = arith.constant 0 : index
    %455 = vector.load %arg1[%c373, %c0_112] : memref<384x128xbf16, #tpu.memory_space<vmem>>, vector<1x32xbf16>
    %456 = arith.extf %455 : vector<1x32xbf16> to vector<1x32xf32>
    %cst_113 = arith.constant dense<0.000000e+00> : vector<8xf32>
    %457 = vector.multi_reduction <add>, %452, %cst_113 [1] : vector<8x32xf32> to vector<8xf32>
    %458 = vector.shape_cast %457 : vector<8xf32> to vector<8x1xf32>
    %cst_114 = arith.constant 3.200000e+01 : f32
    %459 = vector.broadcast %cst_114 : f32 to vector<8x1xf32>
    %460 = arith.divf %458, %459 : vector<8x1xf32>
    %461 = vector.broadcast %460 : vector<8x1xf32> to vector<8x32xf32>
    %462 = arith.subf %452, %461 : vector<8x32xf32>
    %463 = arith.mulf %462, %462 : vector<8x32xf32>
    %cst_115 = arith.constant dense<0.000000e+00> : vector<8xf32>
    %464 = vector.multi_reduction <add>, %463, %cst_115 [1] : vector<8x32xf32> to vector<8xf32>
    %465 = vector.shape_cast %464 : vector<8xf32> to vector<8x1xf32>
    %cst_116 = arith.constant 3.200000e+01 : f32
    %466 = vector.broadcast %cst_116 : f32 to vector<8x1xf32>
    %467 = arith.divf %465, %466 : vector<8x1xf32>
    %468 = vector.broadcast %460 : vector<8x1xf32> to vector<8x32xf32>
    %469 = arith.subf %452, %468 : vector<8x32xf32>
    %cst_117 = arith.constant 9.99999974E-6 : f32
    %470 = vector.broadcast %cst_117 : f32 to vector<8x1xf32>
    %471 = arith.addf %467, %470 : vector<8x1xf32>
    %472 = math.rsqrt %471 : vector<8x1xf32>
    %473 = vector.broadcast %472 : vector<8x1xf32> to vector<8x32xf32>
    %474 = arith.mulf %469, %473 : vector<8x32xf32>
    %475 = vector.broadcast %454 : vector<1x32xf32> to vector<8x32xf32>
    %476 = arith.mulf %474, %475 : vector<8x32xf32>
    %477 = vector.broadcast %456 : vector<1x32xf32> to vector<8x32xf32>
    %478 = arith.addf %476, %477 : vector<8x32xf32>
    %cst_118 = arith.constant 0.000000e+00 : f32
    %479 = vector.broadcast %cst_118 : f32 to vector<8x32xf32>
    %480 = arith.cmpf ogt, %478, %479 : vector<8x32xf32>
    %cst_119 = arith.constant 0.00999999977 : f32
    %481 = vector.broadcast %cst_119 : f32 to vector<8x32xf32>
    %482 = arith.mulf %481, %478 : vector<8x32xf32>
    %483 = arith.select %480, %478, %482 : vector<8x32xi1>, vector<8x32xf32>
    %484 = arith.truncf %483 : vector<8x32xf32> to vector<8x32xbf16>
    %c288 = arith.constant 288 : index
    %c0_120 = arith.constant 0 : index
    %485 = vector.load %arg1[%c288, %c0_120] : memref<384x128xbf16, #tpu.memory_space<vmem>>, vector<32x128xbf16>
    %cst_121 = arith.constant dense<0.000000e+00> : vector<8x128xf32>
    %486 = tpu.matmul %484, %485, %cst_121 {dimension_numbers = #tpu.dot_dimension_numbers<[1], [0], [0], [1], [0, 0, 1, 1], [], []>} : vector<8x32xbf16>, vector<32x128xbf16>, vector<8x128xf32> -> vector<8x128xf32>
    %487 = vector.extract_strided_slice %486 {offsets = [0, 0], sizes = [8, 32], strides = [1, 1]} : vector<8x128xf32> to vector<8x32xf32>
    %c368 = arith.constant 368 : index
    %c0_122 = arith.constant 0 : index
    %488 = vector.load %arg1[%c368, %c0_122] : memref<384x128xbf16, #tpu.memory_space<vmem>>, vector<1x32xbf16>
    %489 = arith.extf %488 : vector<1x32xbf16> to vector<1x32xf32>
    %490 = vector.broadcast %489 : vector<1x32xf32> to vector<8x32xf32>
    %491 = arith.addf %487, %490 : vector<8x32xf32>
    %c371 = arith.constant 371 : index
    %c0_123 = arith.constant 0 : index
    %492 = vector.load %arg1[%c371, %c0_123] : memref<384x128xbf16, #tpu.memory_space<vmem>>, vector<1x32xbf16>
    %493 = arith.extf %492 : vector<1x32xbf16> to vector<1x32xf32>
    %c374 = arith.constant 374 : index
    %c0_124 = arith.constant 0 : index
    %494 = vector.load %arg1[%c374, %c0_124] : memref<384x128xbf16, #tpu.memory_space<vmem>>, vector<1x32xbf16>
    %495 = arith.extf %494 : vector<1x32xbf16> to vector<1x32xf32>
    %cst_125 = arith.constant dense<0.000000e+00> : vector<8xf32>
    %496 = vector.multi_reduction <add>, %491, %cst_125 [1] : vector<8x32xf32> to vector<8xf32>
    %497 = vector.shape_cast %496 : vector<8xf32> to vector<8x1xf32>
    %cst_126 = arith.constant 3.200000e+01 : f32
    %498 = vector.broadcast %cst_126 : f32 to vector<8x1xf32>
    %499 = arith.divf %497, %498 : vector<8x1xf32>
    %500 = vector.broadcast %499 : vector<8x1xf32> to vector<8x32xf32>
    %501 = arith.subf %491, %500 : vector<8x32xf32>
    %502 = arith.mulf %501, %501 : vector<8x32xf32>
    %cst_127 = arith.constant dense<0.000000e+00> : vector<8xf32>
    %503 = vector.multi_reduction <add>, %502, %cst_127 [1] : vector<8x32xf32> to vector<8xf32>
    %504 = vector.shape_cast %503 : vector<8xf32> to vector<8x1xf32>
    %cst_128 = arith.constant 3.200000e+01 : f32
    %505 = vector.broadcast %cst_128 : f32 to vector<8x1xf32>
    %506 = arith.divf %504, %505 : vector<8x1xf32>
    %507 = vector.broadcast %499 : vector<8x1xf32> to vector<8x32xf32>
    %508 = arith.subf %491, %507 : vector<8x32xf32>
    %cst_129 = arith.constant 9.99999974E-6 : f32
    %509 = vector.broadcast %cst_129 : f32 to vector<8x1xf32>
    %510 = arith.addf %506, %509 : vector<8x1xf32>
    %511 = math.rsqrt %510 : vector<8x1xf32>
    %512 = vector.broadcast %511 : vector<8x1xf32> to vector<8x32xf32>
    %513 = arith.mulf %508, %512 : vector<8x32xf32>
    %514 = vector.broadcast %493 : vector<1x32xf32> to vector<8x32xf32>
    %515 = arith.mulf %513, %514 : vector<8x32xf32>
    %516 = vector.broadcast %495 : vector<1x32xf32> to vector<8x32xf32>
    %517 = arith.addf %515, %516 : vector<8x32xf32>
    %cst_130 = arith.constant 0.000000e+00 : f32
    %518 = vector.broadcast %cst_130 : f32 to vector<8x32xf32>
    %519 = arith.cmpf ogt, %517, %518 : vector<8x32xf32>
    %cst_131 = arith.constant 0.00999999977 : f32
    %520 = vector.broadcast %cst_131 : f32 to vector<8x32xf32>
    %521 = arith.mulf %520, %517 : vector<8x32xf32>
    %522 = arith.select %519, %517, %521 : vector<8x32xi1>, vector<8x32xf32>
    %523 = arith.truncf %522 : vector<8x32xf32> to vector<8x32xbf16>
    %c320 = arith.constant 320 : index
    %c0_132 = arith.constant 0 : index
    %524 = vector.load %arg1[%c320, %c0_132] : memref<384x128xbf16, #tpu.memory_space<vmem>>, vector<32x128xbf16>
    %cst_133 = arith.constant dense<0.000000e+00> : vector<8x128xf32>
    %525 = tpu.matmul %523, %524, %cst_133 {dimension_numbers = #tpu.dot_dimension_numbers<[1], [0], [0], [1], [0, 0, 1, 1], [], []>} : vector<8x32xbf16>, vector<32x128xbf16>, vector<8x128xf32> -> vector<8x128xf32>
    %526 = vector.extract_strided_slice %525 {offsets = [0, 0], sizes = [8, 25], strides = [1, 1]} : vector<8x128xf32> to vector<8x25xf32>
    %c375 = arith.constant 375 : index
    %c0_134 = arith.constant 0 : index
    %527 = vector.load %arg1[%c375, %c0_134] : memref<384x128xbf16, #tpu.memory_space<vmem>>, vector<1x25xbf16>
    %528 = arith.extf %527 : vector<1x25xbf16> to vector<1x25xf32>
    %529 = vector.broadcast %528 : vector<1x25xf32> to vector<8x25xf32>
    %530 = arith.addf %526, %529 : vector<8x25xf32>
    %531 = arith.negf %530 : vector<8x25xf32>
    %532 = math.exp %531 : vector<8x25xf32>
    %cst_135 = arith.constant 1.000000e+00 : f32
    %533 = vector.broadcast %cst_135 : f32 to vector<8x25xf32>
    %534 = arith.addf %533, %532 : vector<8x25xf32>
    %535 = arith.divf %533, %534 : vector<8x25xf32>
    %536 = math.log %535 : vector<8x25xf32>
    %cst_136 = arith.constant 2.30258512 : f32
    %537 = vector.broadcast %cst_136 : f32 to vector<8x25xf32>
    %538 = arith.mulf %537, %536 : vector<8x25xf32>
    %539 = math.exp %538 : vector<8x25xf32>
    %cst_137 = arith.constant 2.000000e+00 : f32
    %540 = vector.broadcast %cst_137 : f32 to vector<8x25xf32>
    %541 = arith.mulf %540, %539 : vector<8x25xf32>
    %cst_138 = arith.constant 1.000000e-07 : f32
    %542 = vector.broadcast %cst_138 : f32 to vector<8x25xf32>
    %543 = arith.addf %541, %542 : vector<8x25xf32>
    %544 = vector.extract_strided_slice %543 {offsets = [0, 0], sizes = [8, 16], strides = [1, 1]} : vector<8x25xf32> to vector<8x16xf32>
    %545 = vector.extract_strided_slice %543 {offsets = [0, 16], sizes = [8, 8], strides = [1, 1]} : vector<8x25xf32> to vector<8x8xf32>
    %546 = vector.extract_strided_slice %543 {offsets = [0, 24], sizes = [8, 1], strides = [1, 1]} : vector<8x25xf32> to vector<8x1xf32>
    %547 = tpu.iota {dimensions = array<i32: 1>} : vector<8x16xi32>
    %c1_i32 = arith.constant 1 : i32
    %548 = vector.broadcast %c1_i32 : i32 to vector<8x16xi32>
    %549 = arith.addi %547, %548 : vector<8x16xi32>
    %550 = arith.sitofp %549 : vector<8x16xi32> to vector<8x16xf32>
    %551 = vector.broadcast %0 : vector<8x1xf32> to vector<8x16xf32>
    %552 = arith.mulf %551, %550 : vector<8x16xf32>
    %cst_139 = arith.constant 8.000000e+03 : f32
    %553 = vector.broadcast %cst_139 : f32 to vector<8x16xf32>
    %554 = arith.cmpf olt, %552, %553 : vector<8x16xf32>
    %555 = arith.extui %554 : vector<8x16xi1> to vector<8x16xi32>
    %556 = arith.sitofp %555 : vector<8x16xi32> to vector<8x16xf32>
    %cst_140 = arith.constant 9.99999974E-5 : f32
    %557 = vector.broadcast %cst_140 : f32 to vector<8x16xf32>
    %558 = arith.addf %556, %557 : vector<8x16xf32>
    %559 = arith.mulf %544, %558 : vector<8x16xf32>
    %cst_141 = arith.constant dense<0.000000e+00> : vector<8xf32>
    %560 = vector.multi_reduction <add>, %559, %cst_141 [1] : vector<8x16xf32> to vector<8xf32>
    %561 = vector.shape_cast %560 : vector<8xf32> to vector<8x1xf32>
    %562 = tpu.reciprocal %561 {approx = true} : vector<8x1xf32> -> vector<8x1xf32>
    %563 = vector.broadcast %562 : vector<8x1xf32> to vector<8x16xf32>
    %564 = arith.mulf %559, %563 : vector<8x16xf32>
    %565 = vector.broadcast %546 : vector<8x1xf32> to vector<8x16xf32>
    %566 = arith.mulf %564, %565 : vector<8x16xf32>
    %c0_142 = arith.constant 0 : index
    %c0_143 = arith.constant 0 : index
    %567 = vector.load %arg2[%c0_142, %c0_143] : memref<8x128xf32, #tpu.memory_space<vmem>>, vector<8x16xf32>
    tpu.vector_store %arg2[%c0_142, %c0_143], %566 {strides = array<i32>} : memref<8x128xf32, #tpu.memory_space<vmem>>, vector<8x16xf32>,
    %c0_144 = arith.constant 0 : index
    %c16 = arith.constant 16 : index
    %568 = vector.load %arg2[%c0_144, %c16] : memref<8x128xf32, #tpu.memory_space<vmem>>, vector<8x8xf32>
    tpu.vector_store %arg2[%c0_144, %c16], %545 {strides = array<i32>} : memref<8x128xf32, #tpu.memory_space<vmem>>, vector<8x8xf32>,
    %c0_145 = arith.constant 0 : index
    %c32 = arith.constant 32 : index
    %569 = vector.load %arg2[%c0_145, %c32] : memref<8x128xf32, #tpu.memory_space<vmem>>, vector<1x32xf32>
    tpu.vector_store %arg2[%c0_145, %c32], %391 {strides = array<i32>} : memref<8x128xf32, #tpu.memory_space<vmem>>, vector<1x32xf32>,
    return
  }
}

</mosaic_0001>

<bundles_post_ra>
// kernel: tpu_custom_call.1
= control target key start
LH: loop header
LB: loop body
LE: loop exit
PB: predicated region body
PF: predicated region fallthrough
CT: control target
= control target key end

     0   :  { %7 = vsyncpa [#allocation4], 0  ;;  %s2400_s0 = inlined_call_operand.hbm [shape: f32[8,128], index: 0, kind: input, shape index: {}]   ;;  %s2401_s1 = inlined_call_operand.hbm [shape: bf16[384,128], index: 1, kind: input, shape index: {}]   ;;  %s2402_s2 = inlined_call_operand.hbm [shape: f32[8,128], index: 2, kind: output, shape index: {}]  }
   0x1   :  { %8 = vsyncpa [#allocation7], 0 }
   0x2   :  { %9 = vsyncpa [#allocation5], 0  ;;  %s1961_s9 = smov [#allocation3]   ;;  %s1962_s11 = smov [#allocation6]  }
   0x3   :  { %s16_s10 = sshll.u32 %s1961_s9, 4  ;;  %s25_s12 = sshll.u32 %s1962_s11, 4  ;;  %s17_s10 = int_to_ptr.vmem [resolvable:$true] %s16_s10  ;;  %s1987_s12 = int_to_ptr.vmem [resolvable:$true] %s25_s12 }
   0x4   :  { %s1889_s15 = scalar_lea.hbm %s2400_s0, 128 }
   0x5   :  { %p1890_p0 = scmp.ne.s32.totalorder %s2400_s0, %s1889_s15  ;;  %p1893_p1 = scmp.lt.u32.totalorder %s1889_s15, %s2400_s0 }
   0x7   :  { %p1895_p2 = pnand %p1893_p1, %p1890_p0 }
   0x9   :  { %1898 = shalt.err (!%p1895_p2)
}
   0xa   :  { %s1899_s20 = scalar_lea.vmem %s17_s10, 128  ;;  %p1904_p4 = scmp.lt.s32.totalorder %s17_s10, %s17_s10 }
   0xb   :  { %p1900_p3 = scmp.ne.s32.totalorder %s17_s10, %s1899_s20  ;;  %p1905_p5 = scmp.lt.s32.totalorder %s1899_s20, %s1899_s20 }
   0xd   :  { %p1906_p6 = por %p1905_p5, %p1904_p4 }
   0xf   :  { %p1907_p7 = pnand %p1906_p6, %p1900_p3 }
  0x11   :  { %1910 = shalt.err (!%p1907_p7)
}
  0x12   :  { %19 = dma.hbm_to_vmem [thread:$0]  %s2400_s0, 128, %s17_s10, [#allocation4]  }
  0x13   :  { %s1911_s25 = scalar_lea.hbm %s2401_s1, 3072 }
  0x14   :  { %p1912_p8 = scmp.ne.s32.totalorder %s2401_s1, %s1911_s25  ;;  %p1915_p9 = scmp.lt.u32.totalorder %s1911_s25, %s2401_s1 }
  0x16   :  { %p1917_p10 = pnand %p1915_p9, %p1912_p8 }
  0x18   :  { %1920 = shalt.err (!%p1917_p10)
}
  0x19   :  { %s1921_s30 = scalar_lea.vmem %s1987_s12, 3072  ;;  %p1926_p12 = scmp.lt.s32.totalorder %s1987_s12, %s1987_s12 }
  0x1a   :  { %p1922_p11 = scmp.ne.s32.totalorder %s1987_s12, %s1921_s30  ;;  %p1927_p13 = scmp.lt.s32.totalorder %s1921_s30, %s1921_s30 }
  0x1c   :  { %p1928_p0 = por %p1927_p13, %p1926_p12 }
  0x1e   :  { %p1929_p1 = pnand %p1928_p0, %p1922_p11 }
  0x20   :  { %1932 = shalt.err (!%p1929_p1)
}
  0x21   :  { %s1963_s0 = smov 64   ;;  %s1964_s3 = smov 4  }
  0x22   :  { %31 = dma.hbm_to_vmem [thread:$0]  %s2401_s1, 3072, %s1987_s12, [#allocation7], %s1963_s0, %s1963_s0, %s1964_s3  }
  0x23   :  { %1955 = dma.done.wait [#allocation4], 128  }
  0x24   :  { %1956 = vsyncadd [#allocation4], 4294967168 }
  0x25   :  { %1957 = dma.done.wait [#allocation7], 3072  }
  0x26   :  { %1958 = vsyncadd [#allocation7], 4294964224  ;;  %v1965_v0 = vmov 0   ;;  %v43_v1 = vlaneseq  ;;  %v39_v2 = vld [vmem:[#allocation3] sm:$0xff]  ;;  %v2025_v7 = vld [vmem:[#allocation6 + $0xb4] sm:$0x1] }
  0x27   :  { %1794 = vset.pattern.permute.xlu0 %v1965_v0  ;;  %v1552_v3 = vadd.f32 40.0, %v39_v2  ;;  %v2027_v8 = vld [vmem:[#allocation6 + $0xb8] sm:$0x4]  ;;  %v1966_v9 = vmov 1   ;;  %v197_v10 = vunpack.c.l.bf16 %v2025_v7  ;;  %v1967_v14 = vmov 0.0   ;;  %v1797_v45 = vld [vmem:[#allocation6] sm:$0xff]  }
  0x28   :  { %48 = vperm.xlu0 %1794, %v39_v2   ;;  %v2020_v4 = vshrl.u32 %v43_v1, 7  ;;  %v1219_v12 = vunpack.c.l.bf16 %v2027_v8  ;;  %1651 = vmatprep.subr.bf16.mxu0 %v1967_v14  ;;  %v2046_v16 = vand.u32 127, %v43_v1  ;;  %v57_v18 = vld [vmem:[#allocation6 + $0xb0] sm:$0x1]  ;;  %vm75_vm1 = vcmask 523264   ;;  %v1798_v46 = vld [vmem:[#allocation6 + $0x8] sm:$0xff]  }
  0x29   :  { %v41_v5 = vmul.f32 0.04, %v1552_v3  ;;  %1663 = vmatprep.subr.bf16.mxu1 %v1967_v14  ;;  %v58_v20 = vunpack.c.l.bf16 %v57_v18  ;;  %1652 = vmatpush3.bf16.msra.mxu0 %v1797_v45  ;;  %v1799_v47 = vld [vmem:[#allocation6 + $0x10] sm:$0xff]   ;;  %vm1968_vm2 = vmmov 0   ;;  %v1800_v48 = vld [vmem:[#allocation6 + $0x18] sm:$0xff]   ;;  %v1802_v45 = vld [vmem:[#allocation6 + $0x28] sm:$0xff]  }
  0x2a   :  { %v2023_v6 = vsub.s32 1, %v2020_v4  ;;  %v2031_v11 = vsub.s32 5, %v2020_v4  ;;  %v1511_v17 = vadd.s32 1, %v2046_v16  ;;  %v2050_v21 = vsub.s32 0, %v2020_v4  ;;  %1653 = vmatprep.subr.bf16.mxu0 %v1967_v14  ;;  %1659 = vmatprep.mubr.msk.bf16.mxu0 %vm1968_vm2, %v1967_v14  ;;  %v2086_v54 = vld [vmem:[#allocation6 + $0xb0] sm:$0x4] }
  0x2b   :  { %vm45_vm0 = vcmp.lt.s32.totalorder %v2046_v16, 32  ;;  %1671 = vmatprep.mubr.msk.bf16.mxu1 %vm1968_vm2, %v1967_v14  ;;  %v2088_v55 = vld [vmem:[#allocation6 + $0xb0] sm:$0x8]  ;;  %v70_v56 = vunpack.c.l.bf16 %v2086_v54  ;;  %v2092_v57 = vsub.s32 4, %v2020_v4  ;;  %v2096_v59 = vsub.s32 7, %v2020_v4  ;;  %s1969_s1 = smov 96  }
  0x2c   :  { %1795 = vset.pattern.permute.xlu0 %v1966_v9  ;;  %v2037_v13 = vrot.slane %v197_v10, %v2023_v6  ;;  %v2044_v15 = vrot.slane %v1219_v12, %v2031_v11  ;;  %v1512_v19 = vcvt.s32.f32 %v1511_v17  ;;  %v62_v24 = vrot.slane %v58_v20, %v2050_v21  ;;  %v2105_v9 = vld [vmem:[#allocation6 + $0xb0] sm:$0x2]  ;;  %s1971_s6 = smov [#allocation8]  }
  0x2d   :  { %53 = vperm.xlu0 %1795, %v41_v5   ;;  %v67_v25 = vrot.slane %v58_v20, %v2023_v6  ;;  %1654 = vmatpush3.bf16.msra.mxu0 %v1798_v46  ;;  %v72_v58 = vunpack.c.l.bf16 %v2088_v55  ;;  %v103_v60 = vrot.slane %v70_v56, %v2092_v57  ;;  %v190_v17 = vunpack.c.l.bf16 %v2105_v9  ;;  %v1803_v46 = vld [vmem:[#allocation6 + $0x30] sm:$0xff]   ;;  %v2159_v9 = vld [vmem:[#allocation6 + $0x68] sm:$0xff]   ;;  %s1542_s7 = sshll.u32 %s1971_s6, 4  ;;  %s1543_s7 = int_to_ptr.vmem [resolvable:$true] %s1542_s7 }
  0x2e   :  { %1655 = vmatprep.subr.bf16.mxu0 %v1967_v14  ;;  %v2109_v18 = vsub.s32 2, %v2020_v4  ;;  %vm462_vm5 = vcmask 261120   ;;  %vm540_vm7 = vcmask 253952   ;;  %vm708_vm8 = vcmask 256002   ;;  %s1933_s8 = scalar_lea.vmem %s1543_s7, 128  ;;  %p1938_p3 = scmp.lt.s32.totalorder %s1543_s7, %s1543_s7 }
  0x2f   :  { %v108_v63 = vrot.slane %v72_v58, %v2096_v59  ;;  %vm878_vm9 = vcmask 258052   ;;  %vm1048_vm10 = vcmask 260102   ;;  %vm623_vm11 = vcmask 254977   ;;  %p1934_p2 = scmp.ne.s32.totalorder %s1543_s7, %s1933_s8  ;;  %p1939_p4 = scmp.lt.s32.totalorder %s1933_s8, %s1933_s8 }
  0x30   :  { %vm792_vm12 = vcmask 257027   ;;  %vm962_vm13 = vcmask 259077   ;;  %vm1132_vm14 = vcmask 261127  }
  0x31   :  { %1656 = vmatpush3.bf16.msra.mxu0 %v1799_v47  ;;  %v1804_v47 = vld [vmem:[#allocation6 + $0x38] sm:$0xff]   ;;  %p1940_p5 = por %p1939_p4, %p1938_p3 }
  0x32   :  { %1657 = vmatprep.subr.bf16.mxu0 %v1967_v14 }
  0x33   :  { %p1941_p6 = pnand %p1940_p5, %p1934_p2 }
  0x35   :  { %1658 = vmatpush3.bf16.msra.mxu0 %v1800_v48 }
  0x36   :  { %1675 = vmatprep.subr.bf16.mxu0 %v1967_v14 }
  0xa7   :  { %v2052_v22 = vpop.permute.xlu0 %48 }
  0xa8   :  { %v2055_v23 = vmul.f32 %v1512_v19, %v2052_v22  ;;  %v194_v19 = vrot.slane %v190_v17, %v2109_v18 }
  0xac   :  { %v2060_v26 = vpop.permute.xlu0 %53 }
  0xad   :  { %v56_v27 = vsel %vm45_vm0, %v2052_v22, %v2060_v26 }
  0xae   :  { %v63_v28 = vmul.f32 %v62_v24, %v56_v27 }
  0xb0   :  { %v68_v29 = vadd.f32 %v67_v25, %v63_v28 }
  0xb2   :  { %v73_v30 = vsel %vm45_vm0, %v68_v29, 0.0 }
  0xb3   :  { %v76_v31 = vsel %vm75_vm1, %v73_v30, 0.0  ;;  %v74_v32 = vsub.f32 %v68_v29, %v73_v30 }
  0xb4   :  { %77 = vadd.xlane.f32.xlu1 %v76_v31 }
  0xb5   :  { %v79_v33 = vsel %vm75_vm1, %v74_v32, 0.0 }
  0xb8   :  { %80 = vadd.xlane.f32.xlu1 %v79_v33 }
 0x141   :  { %v78_v34 = vpop.xlane.xlu1 %77 }
 0x145   :  { %v81_v35 = vpop.xlane.xlu1 %80 }
 0x146   :  { %v82_v36 = vsel %vm45_vm0, %v78_v34, %v81_v35 }
 0x147   :  { %v83_v37 = vmul.f32 0.03125, %v82_v36 }
 0x149   :  { %v84_v38 = vsub.f32 %v68_v29, %v83_v37 }
 0x14b   :  { %v85_v39 = vsel %vm45_vm0, %v84_v38, 0.0 }
 0x14c   :  { %v87_v40 = vmul.f32 %v85_v39, %v85_v39  ;;  %v86_v41 = vsub.f32 %v84_v38, %v85_v39 }
 0x14e   :  { %v88_v42 = vsel %vm75_vm1, %v87_v40, 0.0  ;;  %v91_v43 = vmul.f32 %v86_v41, %v86_v41 }
 0x14f   :  { %89 = vadd.xlane.f32.xlu1 %v88_v42 }
 0x150   :  { %v92_v44 = vsel %vm75_vm1, %v91_v43, 0.0 }
 0x151   :  { %93 = vadd.xlane.f32.xlu0 %v92_v44  ;;  %v1801_v44 = vld [vmem:[#allocation6 + $0x20] sm:$0xff]  }
 0x152   :  { %1664 = vmatpush3.bf16.msra.mxu1 %v1801_v44 }
 0x153   :  { %1665 = vmatprep.subr.bf16.mxu1 %v1967_v14 }
 0x156   :  { %1666 = vmatpush3.bf16.msra.mxu1 %v1802_v45 }
 0x157   :  { %1667 = vmatprep.subr.bf16.mxu1 %v1967_v14 }
 0x15a   :  { %1668 = vmatpush3.bf16.msra.mxu1 %v1803_v46  ;;  %v1807_v46 = vld [vmem:[#allocation6 + $0x40] sm:$0xff]  }
 0x15b   :  { %1669 = vmatprep.subr.bf16.mxu1 %v1967_v14 }
 0x15e   :  { %1670 = vmatpush3.bf16.msra.mxu1 %v1804_v47  ;;  %v1808_v47 = vld [vmem:[#allocation6 + $0x48] sm:$0xff]  }
 0x15f   :  { %1687 = vmatprep.subr.bf16.mxu1 %v1967_v14 }
 0x1dc   :  { %v90_v49 = vpop.xlane.xlu1 %89 }
 0x1de   :  { %v94_v50 = vpop.xlane.xlu0 %93 }
 0x1df   :  { %v95_v51 = vsel %vm45_vm0, %v90_v49, %v94_v50 }
 0x1e0   :  { %v96_v52 = vmul.f32 0.03125, %v95_v51 }
 0x1e2   :  { %v97_v53 = vadd.f32 1e-05, %v96_v52 }
 0x1e4   :  { %1819 = vrsqrt.f32 %v97_v53  ;;  %v227_v53 = vrot.slane %v70_v56, %v2031_v11  ;;  %v315_v56 = vsub.s32 3, %v2020_v4 }
 0x1ee   :  { %v1820_v61 = vpop.eup %1819 }
 0x1ef   :  { %v99_v62 = vmul.f32 %v1820_v61, %v84_v38 }
 0x1f1   :  { %v104_v0 = vmul.f32 %v103_v60, %v99_v62  ;;  %v232_v60 = vrot.slane %v197_v10, %v2050_v21  ;;  %v2145_v10 = vld [vmem:[#allocation3] sm:$0x1] }
 0x1f3   :  { %v109_v1 = vadd.f32 %v108_v63, %v104_v0 }
 0x1f5   :  { %vm110_vm3 = vcmp.gt.f32.partialorder %v109_v1, 0.0  ;;  %v111_v2 = vmul.f32 0.01, %v109_v1 }
 0x1f7   :  { %v112_v3 = vsel %vm110_vm3, %v109_v1, %v111_v2  ;;  %vm1519_vm3 = vcmask 130048  }
 0x1f8   :  { %v113_v5 = vpack.c.bf16 %v112_v3, %v112_v3  ;;  %v2137_v3 = vld [vmem:[#allocation6 + $0xb8] sm:$0x2] }
 0x1fa   :  { %1660 = vmatmul.mubr.msk.bf16.vlgmr.msra.gmra.mrb[0].mxu0 %vm75_vm1, %v113_v5  ;;  %v1313_v5 = vunpack.c.l.bf16 %v2137_v3 }
 0x1fb   :  { %1683 = vmatprep.mubr.msk.bf16.mxu0 %vm1968_vm2, %v1967_v14  ;;  %1676 = vmatpush3.bf16.msra.mxu0 %v1807_v46 }
 0x1fc   :  { %v2143_v7 = vrot.slane %v1313_v5, %v315_v56  ;;  %1677 = vmatprep.subr.bf16.mxu0 %v1967_v14 }
 0x1ff   :  { %1678 = vmatpush3.bf16.msra.mxu0 %v1808_v47 }
 0x200   :  { %1679 = vmatprep.subr.bf16.mxu0 %v1967_v14 }
 0x2cd   :  { %v183_v20 = vpop.f32.mrb[0].mxu0 }
 0x2ce   :  { %v195_v24 = vadd.f32 %v194_v19, %v183_v20  ;;  %v1661_v25 = vpop.f32.mrb[1].mxu0  ;;  %v443_v19 = vpack.c.bf16 %v2145_v10, %v2145_v10  ;;  %v316_v20 = vrot.slane %v190_v17, %v315_v56 }
 0x2cf   :  { %v186_v27 = vpop.f32.mrb[2].mxu0 }
 0x2d0   :  { %v1662_v28 = vpop.f32.mrb[3].mxu0  ;;  %v198_v29 = vsel %vm45_vm0, %v195_v24, 0.0  ;;  %445 = vrot.lane.b32.xlu0 %v443_v19, %s1963_s0  ;;  %v2188_v19 = vsub.s32 6, %v2020_v4 }
 0x2d1   :  { %v200_v30 = vsel %vm75_vm1, %v198_v29, 0.0  ;;  %v199_v31 = vsub.f32 %v195_v24, %v198_v29 }
 0x2d2   :  { %201 = vadd.xlane.f32.xlu1 %v200_v30 }
 0x2d3   :  { %v203_v32 = vsel %vm75_vm1, %v199_v31, 0.0 }
 0x2d6   :  { %204 = vadd.xlane.f32.xlu1 %v203_v32 }
 0x342   :  { %v446_v17 = vpop.permute.xlu0 %445 }
 0x35f   :  { %v202_v33 = vpop.xlane.xlu1 %201 }
 0x363   :  { %v205_v34 = vpop.xlane.xlu1 %204 }
 0x364   :  { %v206_v35 = vsel %vm45_vm0, %v202_v33, %v205_v34  ;;  %v2156_v34 = vld [vmem:[#allocation6 + $0x60] sm:$0xff]  }
 0x365   :  { %v207_v36 = vmul.f32 0.03125, %v206_v35 }
 0x367   :  { %v208_v37 = vsub.f32 %v195_v24, %v207_v36 }
 0x369   :  { %v209_v38 = vsel %vm45_vm0, %v208_v37, 0.0 }
 0x36a   :  { %v211_v39 = vmul.f32 %v209_v38, %v209_v38  ;;  %v210_v40 = vsub.f32 %v208_v37, %v209_v38 }
 0x36c   :  { %v212_v41 = vsel %vm75_vm1, %v211_v39, 0.0  ;;  %v215_v42 = vmul.f32 %v210_v40, %v210_v40 }
 0x36d   :  { %213 = vadd.xlane.f32.xlu1 %v212_v41 }
 0x36e   :  { %v216_v43 = vsel %vm75_vm1, %v215_v42, 0.0 }
 0x371   :  { %217 = vadd.xlane.f32.xlu1 %v216_v43 }
 0x3fa   :  { %v214_v48 = vpop.xlane.xlu1 %213 }
 0x3fe   :  { %v218_v49 = vpop.xlane.xlu1 %217 }
 0x3ff   :  { %v219_v50 = vsel %vm45_vm0, %v214_v48, %v218_v49  ;;  %v1809_v48 = vld [vmem:[#allocation6 + $0x50] sm:$0xff]   ;;  %v1810_v49 = vld [vmem:[#allocation6 + $0x58] sm:$0xff]  }
 0x400   :  { %v220_v51 = vmul.f32 0.03125, %v219_v50  ;;  %1680 = vmatpush3.bf16.msra.mxu0 %v1809_v48  ;;  %v366_v50 = vld [vmem:[#allocation6 + $0xb4] sm:$0x2] }
 0x401   :  { %1681 = vmatprep.subr.bf16.mxu0 %v1967_v14 }
 0x402   :  { %v221_v52 = vadd.f32 1e-05, %v220_v51  ;;  %v367_v51 = vunpack.c.l.bf16 %v366_v50 }
 0x404   :  { %1821 = vrsqrt.f32 %v221_v52  ;;  %1682 = vmatpush3.bf16.msra.mxu0 %v1810_v49  ;;  %v2181_v52 = vrot.slane %v367_v51, 3  ;;  %v371_v4 = vrot.slane %v367_v51, %v2109_v18 }
 0x405   :  { %1703 = vmatprep.subr.bf16.mxu0 %v1967_v14 }
 0x40e   :  { %v1822_v54 = vpop.eup %1821 }
 0x40f   :  { %v223_v61 = vmul.f32 %v1822_v54, %v208_v37 }
 0x411   :  { %v228_v62 = vmul.f32 %v227_v53, %v223_v61 }
 0x413   :  { %v233_v63 = vadd.f32 %v232_v60, %v228_v62 }
 0x415   :  { %vm234_vm4 = vcmp.gt.f32.partialorder %v233_v63, 0.0  ;;  %v235_v0 = vmul.f32 0.01, %v233_v63 }
 0x417   :  { %v236_v1 = vsel %vm234_vm4, %v233_v63, %v235_v0  ;;  %vm1532_vm4 = vcmask 195712  }
 0x418   :  { %v237_v2 = vpack.c.bf16 %v236_v1, %v236_v1 }
 0x41a   :  { %1672 = vmatmul.mubr.msk.bf16.vlgmr.msra.gmra.mrb[0].mxu1 %vm75_vm1, %v237_v2 }
 0x41b   :  { %1691 = vmatprep.mubr.msk.bf16.mxu1 %vm1968_vm2, %v1967_v14  ;;  %1688 = vmatpush3.bf16.msra.mxu1 %v2156_v34 }
 0x41c   :  { %1689 = vmatprep.subr.bf16.mxu1 %v1967_v14 }
 0x41f   :  { %1690 = vmatpush3.bf16.msra.mxu1 %v2159_v9 }
 0x420   :  { %1695 = vmatprep.subr.bf16.mxu1 %v1967_v14 }
 0x422   :  { %1692 = vmatmul.mubr.msk.bf16.vlgmr.msra.gmra.mrb[4].mxu1 %vm462_vm5, %v446_v17 }
 0x423   :  { %1696 = vmatpush3.bf16.msra.mxu1 %v2156_v34  ;;  %1699 = vmatprep.mubr.msk.bf16.mxu1 %vm1968_vm2, %v1967_v14 }
 0x424   :  { %1697 = vmatprep.subr.bf16.mxu1 %v1967_v14 }
 0x427   :  { %1698 = vmatpush3.bf16.msra.mxu1 %v2159_v9 }
 0x428   :  { %1711 = vmatprep.subr.bf16.mxu1 %v1967_v14 }
 0x4ed   :  { %v307_v24 = vpop.f32.mrb[0].mxu1 }
 0x4ee   :  { %v317_v25 = vadd.f32 %v316_v20, %v307_v24  ;;  %v1673_v27 = vpop.f32.mrb[1].mxu1  ;;  %v347_v20 = vrot.slane %v72_v58, %v2188_v19 }
 0x4ef   :  { %v310_v28 = vpop.f32.mrb[2].mxu1 }
 0x4f0   :  { %v1674_v29 = vpop.f32.mrb[3].mxu1  ;;  %v318_v30 = vsel %vm45_vm0, %v317_v25, 0.0 }
 0x4f1   :  { %v320_v31 = vsel %vm75_vm1, %v318_v30, 0.0  ;;  %v319_v32 = vsub.f32 %v317_v25, %v318_v30 }
 0x4f2   :  { %321 = vadd.xlane.f32.xlu1 %v320_v31 }
 0x4f3   :  { %v323_v33 = vsel %vm75_vm1, %v319_v32, 0.0 }
 0x4f5   :  { %v500_v53 = vpop.f32.mrb[4].mxu1 }
 0x4f6   :  { %324 = vadd.xlane.f32.xlu1 %v323_v33  ;;  %v501_v54 = vadd.f32 %v500_v53, %v2181_v52  ;;  %v1693_v60 = vpop.f32.mrb[5].mxu1 }
 0x4f7   :  { %v503_v61 = vpop.f32.mrb[6].mxu1 }
 0x4f8   :  { %v1694_v62 = vpop.f32.mrb[7].mxu1 }
 0x57f   :  { %v322_v35 = vpop.xlane.xlu1 %321 }
 0x583   :  { %v325_v36 = vpop.xlane.xlu1 %324 }
 0x584   :  { %v326_v37 = vsel %vm45_vm0, %v322_v35, %v325_v36 }
 0x585   :  { %v327_v38 = vmul.f32 0.03125, %v326_v37 }
 0x587   :  { %v328_v39 = vsub.f32 %v317_v25, %v327_v38 }
 0x589   :  { %v329_v40 = vsel %vm45_vm0, %v328_v39, 0.0 }
 0x58a   :  { %v331_v41 = vmul.f32 %v329_v40, %v329_v40  ;;  %v330_v42 = vsub.f32 %v328_v39, %v329_v40 }
 0x58c   :  { %v332_v43 = vsel %vm75_vm1, %v331_v41, 0.0  ;;  %v335_v44 = vmul.f32 %v330_v42, %v330_v42 }
 0x58d   :  { %333 = vadd.xlane.f32.xlu1 %v332_v43 }
 0x58e   :  { %v336_v45 = vsel %vm75_vm1, %v335_v44, 0.0 }
 0x591   :  { %337 = vadd.xlane.f32.xlu1 %v336_v45 }
 0x5a2   :  { %514 = vrot.lane.b32.xlu1 %v501_v54, %s1963_s0 }
 0x61a   :  { %v334_v63 = vpop.xlane.xlu1 %333 }
 0x61e   :  { %v338_v0 = vpop.xlane.xlu1 %337 }
 0x61f   :  { %v339_v1 = vsel %vm45_vm0, %v334_v63, %v338_v0 }
 0x620   :  { %v340_v2 = vmul.f32 0.03125, %v339_v1 }
 0x622   :  { %v341_v56 = vadd.f32 1e-05, %v340_v2  ;;  %v515_v37 = vpop.permute.xlu1 %514 }
 0x624   :  { %1823 = vrsqrt.f32 %v341_v56 }
 0x62e   :  { %v1824_v24 = vpop.eup %1823 }
 0x62f   :  { %v343_v25 = vmul.f32 %v1824_v24, %v328_v39 }
 0x631   :  { %v348_v27 = vmul.f32 %v347_v20, %v343_v25 }
 0x633   :  { %v353_v28 = vadd.f32 %v2037_v13, %v348_v27 }
 0x635   :  { %vm354_vm6 = vcmp.gt.f32.partialorder %v353_v28, 0.0  ;;  %v355_v29 = vmul.f32 0.01, %v353_v28 }
 0x637   :  { %v356_v30 = vsel %vm354_vm6, %v353_v28, %v355_v29 }
 0x638   :  { %v357_v16 = vpack.c.bf16 %v356_v30, %v356_v30 }
 0x63a   :  { %1684 = vmatmul.mubr.msk.bf16.vlgmr.msra.gmra.mrb[4].mxu0 %vm75_vm1, %v357_v16 }
 0x63b   :  { %1704 = vmatpush3.bf16.msra.mxu0 %v2156_v34  ;;  %1707 = vmatprep.mubr.msk.bf16.mxu0 %vm1968_vm2, %v1967_v14 }
 0x63c   :  { %1705 = vmatprep.subr.bf16.mxu0 %v1967_v14 }
 0x63f   :  { %1706 = vmatpush3.bf16.msra.mxu0 %v2159_v9 }
 0x640   :  { %1719 = vmatprep.subr.bf16.mxu0 %v1967_v14 }
 0x70d   :  { %v433_v13 = vpop.f32.mrb[4].mxu0 }
 0x70e   :  { %v2202_v55 = vadd.f32 %v433_v13, %v371_v4  ;;  %v1685_v58 = vpop.f32.mrb[5].mxu0 }
 0x70f   :  { %v436_v31 = vpop.f32.mrb[6].mxu0 }
 0x710   :  { %v1686_v32 = vpop.f32.mrb[7].mxu0  ;;  %v506_v33 = vadd.f32 %v501_v54, %v2202_v55 }
 0x712   :  { %v1571_v17 = vmul.f32 -1.442695, %v506_v33 }
 0x714   :  { %1825 = vpow2.f32 %v1571_v17 }
 0x71e   :  { %v1826_v35 = vpop.eup %1825 }
 0x71f   :  { %v510_v36 = vadd.f32 1.0, %v1826_v35 }
 0x721   :  { %1827 = vrcp.f32 %v510_v36 }
 0x72b   :  { %v1828_v38 = vpop.eup %1827 }
 0x72c   :  { %v517_v39 = vmul.f32 %v1828_v38, %v515_v37  ;;  %v524_v44 = vsub.f32 1.0, %v1828_v38 }
 0x72e   :  { %519 = vrot.lane.b32.xlu1 %v517_v39, %s1963_s0 }
 0x732   :  { %531 = vrot.lane.b32.xlu1 %v2145_v10, %s1969_s1 }
 0x7a0   :  { %v520_v40 = vpop.permute.xlu1 %519 }
 0x7a1   :  { %v522_v41 = vadd.f32 %v520_v40, %v2202_v55 }
 0x7a3   :  { %1829 = vtanh.f32 %v522_v41 }
 0x7a4   :  { %v532_v43 = vpop.permute.xlu1 %531 }
 0x7a5   :  { %v534_v46 = vmul.f32 %v1828_v38, %v532_v43 }
 0x7ad   :  { %v1830_v42 = vpop.eup %1829 }
 0x7ae   :  { %526 = vrot.lane.b32.xlu0 %v1830_v42, %s1969_s1 }
 0x820   :  { %v527_v45 = vpop.permute.xlu0 %526 }
 0x821   :  { %v529_v47 = vmul.f32 %v527_v45, %v524_v44 }
 0x823   :  { %v2210_v48 = vadd.f32 %v534_v46, %v529_v47 }
 0x825   :  { %v542_v49 = vpack.c.bf16 %v2210_v48, %v2210_v48  ;;  %v615_v29 = vrot.slane %v2210_v48, 7 }
 0x827   :  { %544 = vrot.lane.b32.xlu0 %v542_v49, %s1969_s1 }
 0x899   :  { %v545_v10 = vpop.permute.xlu0 %544 }
 0x89a   :  { %1700 = vmatmul.mubr.msk.bf16.vlgmr.msra.gmra.mrb[8].mxu1 %vm462_vm5, %v545_v10 }
 0x89b   :  { %1712 = vmatpush3.bf16.msra.mxu1 %v2156_v34  ;;  %1715 = vmatprep.mubr.msk.bf16.mxu1 %vm1968_vm2, %v1967_v14 }
 0x89c   :  { %1713 = vmatprep.subr.bf16.mxu1 %v1967_v14 }
 0x89f   :  { %1714 = vmatpush3.bf16.msra.mxu1 %v2159_v9 }
 0x8a0   :  { %1727 = vmatprep.subr.bf16.mxu1 %v1967_v14 }
 0x96d   :  { %v583_v50 = vpop.f32.mrb[8].mxu1 }
 0x96e   :  { %v584_v51 = vadd.f32 %v583_v50, %v2181_v52  ;;  %v1701_v53 = vpop.f32.mrb[9].mxu1 }
 0x96f   :  { %v586_v54 = vpop.f32.mrb[10].mxu1 }
 0x970   :  { %v590_v60 = vrot.slane %v584_v51, 7  ;;  %v1702_v61 = vpop.f32.mrb[11].mxu1 }
 0x972   :  { %599 = vrot.lane.b32.xlu1 %v590_v60, %s1963_s0  ;;  %v592_v62 = vadd.f32 %v590_v60, %v2202_v55 }
 0x974   :  { %v1573_v63 = vmul.f32 -1.442695, %v592_v62 }
 0x976   :  { %1831 = vpow2.f32 %v1573_v63 }
 0x980   :  { %v1832_v0 = vpop.eup %1831 }
 0x981   :  { %v596_v1 = vadd.f32 1.0, %v1832_v0 }
 0x983   :  { %1833 = vrcp.f32 %v596_v1 }
 0x98d   :  { %v1834_v2 = vpop.eup %1833 }
 0x98e   :  { %v609_v28 = vsub.f32 1.0, %v1834_v2  ;;  %v617_v16 = vmul.f32 %v1834_v2, %v615_v29 }
 0x9e4   :  { %v600_v56 = vpop.permute.xlu1 %599 }
 0x9e5   :  { %v602_v20 = vmul.f32 %v1834_v2, %v600_v56 }
 0x9e7   :  { %604 = vrot.lane.b32.xlu0 %v602_v20, %s1963_s0 }
 0xa59   :  { %v605_v24 = vpop.permute.xlu0 %604 }
 0xa5a   :  { %v607_v25 = vadd.f32 %v605_v24, %v2202_v55 }
 0xa5c   :  { %1835 = vtanh.f32 %v607_v25 }
 0xa66   :  { %v1836_v27 = vpop.eup %1835 }
 0xa67   :  { %611 = vrot.lane.b32.xlu1 %v1836_v27, %s1969_s1 }
 0xad9   :  { %v612_v30 = vpop.permute.xlu1 %611 }
 0xada   :  { %v614_v4 = vmul.f32 %v612_v30, %v609_v28 }
 0xadc   :  { %v2229_v13 = vadd.f32 %v617_v16, %v614_v4 }
 0xade   :  { %v625_v58 = vpack.c.bf16 %v2229_v13, %v2229_v13  ;;  %v700_v50 = vrot.slane %v2229_v13, 7 }
 0xae0   :  { %v627_v31 = vshrl.u32 %v625_v58, 16 }
 0xae2   :  { %629 = vrot.lane.b32.xlu0 %v627_v31, %s1969_s1 }
 0xb54   :  { %v630_v32 = vpop.permute.xlu0 %629 }
 0xb55   :  { %1708 = vmatmul.mubr.msk.bf16.vlgmr.msra.gmra.mrb[8].mxu0 %vm462_vm5, %v630_v32 }
 0xb56   :  { %1720 = vmatpush3.bf16.msra.mxu0 %v2156_v34  ;;  %1723 = vmatprep.mubr.msk.bf16.mxu0 %vm1968_vm2, %v1967_v14 }
 0xb57   :  { %1721 = vmatprep.subr.bf16.mxu0 %v1967_v14 }
 0xb5a   :  { %1722 = vmatpush3.bf16.msra.mxu0 %v2159_v9 }
 0xb5b   :  { %1735 = vmatprep.subr.bf16.mxu0 %v1967_v14 }
 0xc28   :  { %v668_v33 = vpop.f32.mrb[8].mxu0 }
 0xc29   :  { %v669_v17 = vadd.f32 %v668_v33, %v2181_v52  ;;  %v1709_v35 = vpop.f32.mrb[9].mxu0 }
 0xc2a   :  { %v671_v36 = vpop.f32.mrb[10].mxu0 }
 0xc2b   :  { %v675_v37 = vrot.slane %v669_v17, 6  ;;  %v1710_v38 = vpop.f32.mrb[11].mxu0 }
 0xc2d   :  { %684 = vrot.lane.b32.xlu1 %v675_v37, %s1963_s0  ;;  %v677_v39 = vadd.f32 %v675_v37, %v2202_v55 }
 0xc2f   :  { %v1575_v40 = vmul.f32 -1.442695, %v677_v39 }
 0xc31   :  { %1837 = vpow2.f32 %v1575_v40 }
 0xc3b   :  { %v1838_v41 = vpop.eup %1837 }
 0xc3c   :  { %v681_v42 = vadd.f32 1.0, %v1838_v41 }
 0xc3e   :  { %1839 = vrcp.f32 %v681_v42 }
 0xc48   :  { %v1840_v43 = vpop.eup %1839 }
 0xc49   :  { %v694_v10 = vsub.f32 1.0, %v1840_v43  ;;  %v702_v53 = vmul.f32 %v1840_v43, %v700_v50 }
 0xc9f   :  { %v685_v44 = vpop.permute.xlu1 %684 }
 0xca0   :  { %v687_v45 = vmul.f32 %v1840_v43, %v685_v44 }
 0xca2   :  { %689 = vrot.lane.b32.xlu0 %v687_v45, %s1963_s0 }
 0xd14   :  { %v690_v46 = vpop.permute.xlu0 %689 }
 0xd15   :  { %v692_v47 = vadd.f32 %v690_v46, %v2202_v55 }
 0xd17   :  { %1841 = vtanh.f32 %v692_v47 }
 0xd21   :  { %v1842_v49 = vpop.eup %1841 }
 0xd22   :  { %696 = vrot.lane.b32.xlu1 %v1842_v49, %s1969_s1 }
 0xd94   :  { %v697_v51 = vpop.permute.xlu1 %696 }
 0xd95   :  { %v699_v54 = vmul.f32 %v697_v51, %v694_v10 }
 0xd97   :  { %v2248_v60 = vadd.f32 %v702_v53, %v699_v54 }
 0xd99   :  { %v710_v61 = vpack.c.bf16 %v2248_v60, %v2248_v60  ;;  %v784_v17 = vrot.slane %v2248_v60, 7 }
 0xd9b   :  { %v712_v62 = vrot.slane %v710_v61, 1 }
 0xd9d   :  { %713 = vrot.lane.b32.xlu0 %v712_v62, %s1969_s1 }
 0xe0f   :  { %v714_v63 = vpop.permute.xlu0 %713 }
 0xe10   :  { %1716 = vmatmul.mubr.msk.bf16.vlgmr.msra.gmra.mrb[12].mxu1 %vm462_vm5, %v714_v63 }
 0xe11   :  { %1728 = vmatpush3.bf16.msra.mxu1 %v2156_v34  ;;  %1731 = vmatprep.mubr.msk.bf16.mxu1 %vm1968_vm2, %v1967_v14 }
 0xe12   :  { %1729 = vmatprep.subr.bf16.mxu1 %v1967_v14 }
 0xe15   :  { %1730 = vmatpush3.bf16.msra.mxu1 %v2159_v9 }
 0xe16   :  { %1743 = vmatprep.subr.bf16.mxu1 %v1967_v14 }
 0xee3   :  { %v752_v0 = vpop.f32.mrb[12].mxu1 }
 0xee4   :  { %v753_v1 = vadd.f32 %v752_v0, %v2181_v52  ;;  %v1717_v2 = vpop.f32.mrb[13].mxu1 }
 0xee5   :  { %v755_v56 = vpop.f32.mrb[14].mxu1 }
 0xee6   :  { %v759_v20 = vrot.slane %v753_v1, 5  ;;  %v1718_v24 = vpop.f32.mrb[15].mxu1 }
 0xee8   :  { %768 = vrot.lane.b32.xlu1 %v759_v20, %s1963_s0  ;;  %v761_v25 = vadd.f32 %v759_v20, %v2202_v55 }
 0xeea   :  { %v1577_v27 = vmul.f32 -1.442695, %v761_v25 }
 0xeec   :  { %1843 = vpow2.f32 %v1577_v27 }
 0xef6   :  { %v1844_v28 = vpop.eup %1843 }
 0xef7   :  { %v765_v29 = vadd.f32 1.0, %v1844_v28 }
 0xef9   :  { %1845 = vrcp.f32 %v765_v29 }
 0xf03   :  { %v1846_v30 = vpop.eup %1845 }
 0xf04   :  { %v778_v33 = vsub.f32 1.0, %v1846_v30  ;;  %v786_v36 = vmul.f32 %v1846_v30, %v784_v17 }
 0xf5a   :  { %v769_v16 = vpop.permute.xlu1 %768 }
 0xf5b   :  { %v771_v4 = vmul.f32 %v1846_v30, %v769_v16 }
 0xf5d   :  { %773 = vrot.lane.b32.xlu0 %v771_v4, %s1963_s0 }
 0xfcf   :  { %v774_v58 = vpop.permute.xlu0 %773 }
 0xfd0   :  { %v776_v31 = vadd.f32 %v774_v58, %v2202_v55 }
 0xfd2   :  { %1847 = vtanh.f32 %v776_v31 }
 0xfdc   :  { %v1848_v32 = vpop.eup %1847 }
 0xfdd   :  { %780 = vrot.lane.b32.xlu1 %v1848_v32, %s1969_s1 }
0x104f   :  { %v781_v35 = vpop.permute.xlu1 %780 }
0x1050   :  { %v783_v37 = vmul.f32 %v781_v35, %v778_v33 }
0x1052   :  { %v2267_v38 = vadd.f32 %v786_v36, %v783_v37 }
0x1054   :  { %v794_v39 = vpack.c.bf16 %v2267_v38, %v2267_v38  ;;  %v870_v56 = vrot.slane %v2267_v38, 7 }
0x1056   :  { %v796_v40 = vshrl.u32 %v794_v39, 16 }
0x1058   :  { %v798_v41 = vrot.slane %v796_v40, 1 }
0x105a   :  { %799 = vrot.lane.b32.xlu0 %v798_v41, %s1969_s1 }
0x10cc   :  { %v800_v42 = vpop.permute.xlu0 %799 }
0x10cd   :  { %1724 = vmatmul.mubr.msk.bf16.vlgmr.msra.gmra.mrb[12].mxu0 %vm462_vm5, %v800_v42 }
0x10ce   :  { %1736 = vmatpush3.bf16.msra.mxu0 %v2156_v34  ;;  %1739 = vmatprep.mubr.msk.bf16.mxu0 %vm1968_vm2, %v1967_v14 }
0x10cf   :  { %1737 = vmatprep.subr.bf16.mxu0 %v1967_v14 }
0x10d2   :  { %1738 = vmatpush3.bf16.msra.mxu0 %v2159_v9 }
0x10d3   :  { %1751 = vmatprep.subr.bf16.mxu0 %v1967_v14 }
0x11a0   :  { %v838_v43 = vpop.f32.mrb[12].mxu0 }
0x11a1   :  { %v839_v44 = vadd.f32 %v838_v43, %v2181_v52  ;;  %v1725_v45 = vpop.f32.mrb[13].mxu0 }
0x11a2   :  { %v841_v46 = vpop.f32.mrb[14].mxu0 }
0x11a3   :  { %v845_v47 = vrot.slane %v839_v44, 4  ;;  %v1726_v49 = vpop.f32.mrb[15].mxu0 }
0x11a5   :  { %854 = vrot.lane.b32.xlu1 %v845_v47, %s1963_s0  ;;  %v847_v10 = vadd.f32 %v845_v47, %v2202_v55 }
0x11a7   :  { %v1579_v50 = vmul.f32 -1.442695, %v847_v10 }
0x11a9   :  { %1849 = vpow2.f32 %v1579_v50 }
0x11b3   :  { %v1850_v51 = vpop.eup %1849 }
0x11b4   :  { %v851_v53 = vadd.f32 1.0, %v1850_v51 }
0x11b6   :  { %1851 = vrcp.f32 %v851_v53 }
0x11c0   :  { %v1852_v54 = vpop.eup %1851 }
0x11c1   :  { %v864_v2 = vsub.f32 1.0, %v1852_v54  ;;  %v872_v24 = vmul.f32 %v1852_v54, %v870_v56 }
0x1217   :  { %v855_v61 = vpop.permute.xlu1 %854 }
0x1218   :  { %v857_v62 = vmul.f32 %v1852_v54, %v855_v61 }
0x121a   :  { %859 = vrot.lane.b32.xlu0 %v857_v62, %s1963_s0 }
0x128c   :  { %v860_v63 = vpop.permute.xlu0 %859 }
0x128d   :  { %v862_v0 = vadd.f32 %v860_v63, %v2202_v55 }
0x128f   :  { %1853 = vtanh.f32 %v862_v0 }
0x1299   :  { %v1854_v1 = vpop.eup %1853 }
0x129a   :  { %866 = vrot.lane.b32.xlu1 %v1854_v1, %s1969_s1 }
0x130c   :  { %v867_v20 = vpop.permute.xlu1 %866 }
0x130d   :  { %v869_v25 = vmul.f32 %v867_v20, %v864_v2 }
0x130f   :  { %v2286_v27 = vadd.f32 %v872_v24, %v869_v25 }
0x1311   :  { %v880_v28 = vpack.c.bf16 %v2286_v27, %v2286_v27  ;;  %v954_v44 = vrot.slane %v2286_v27, 7 }
0x1313   :  { %v882_v29 = vrot.slane %v880_v28, 2 }
0x1315   :  { %883 = vrot.lane.b32.xlu0 %v882_v29, %s1969_s1 }
0x1387   :  { %v884_v30 = vpop.permute.xlu0 %883 }
0x1388   :  { %1732 = vmatmul.mubr.msk.bf16.vlgmr.msra.gmra.mrb[16].mxu1 %vm462_vm5, %v884_v30 }
0x1389   :  { %1744 = vmatpush3.bf16.msra.mxu1 %v2156_v34  ;;  %1747 = vmatprep.mubr.msk.bf16.mxu1 %vm1968_vm2, %v1967_v14 }
0x138a   :  { %1745 = vmatprep.subr.bf16.mxu1 %v1967_v14 }
0x138d   :  { %1746 = vmatpush3.bf16.msra.mxu1 %v2159_v9 }
0x138e   :  { %1759 = vmatprep.subr.bf16.mxu1 %v1967_v14 }
0x145b   :  { %v922_v16 = vpop.f32.mrb[16].mxu1 }
0x145c   :  { %v923_v4 = vadd.f32 %v922_v16, %v2181_v52  ;;  %v1733_v58 = vpop.f32.mrb[17].mxu1 }
0x145d   :  { %v925_v31 = vpop.f32.mrb[18].mxu1 }
0x145e   :  { %v929_v32 = vrot.slane %v923_v4, 3  ;;  %v1734_v33 = vpop.f32.mrb[19].mxu1 }
0x1460   :  { %938 = vrot.lane.b32.xlu1 %v929_v32, %s1963_s0  ;;  %v931_v34 = vadd.f32 %v929_v32, %v2202_v55 }
0x1462   :  { %v1581_v17 = vmul.f32 -1.442695, %v931_v34 }
0x1464   :  { %1855 = vpow2.f32 %v1581_v17 }
0x146e   :  { %v1856_v35 = vpop.eup %1855 }
0x146f   :  { %v935_v36 = vadd.f32 1.0, %v1856_v35 }
0x1471   :  { %1857 = vrcp.f32 %v935_v36 }
0x147b   :  { %v1858_v37 = vpop.eup %1857 }
0x147c   :  { %v948_v43 = vsub.f32 1.0, %v1858_v37  ;;  %v956_v46 = vmul.f32 %v1858_v37, %v954_v44 }
0x14d2   :  { %v939_v9 = vpop.permute.xlu1 %938 }
0x14d3   :  { %v941_v39 = vmul.f32 %v1858_v37, %v939_v9 }
0x14d5   :  { %943 = vrot.lane.b32.xlu0 %v941_v39, %s1963_s0 }
0x1547   :  { %v944_v40 = vpop.permute.xlu0 %943 }
0x1548   :  { %v946_v41 = vadd.f32 %v944_v40, %v2202_v55 }
0x154a   :  { %1859 = vtanh.f32 %v946_v41 }
0x1554   :  { %v1860_v42 = vpop.eup %1859 }
0x1555   :  { %950 = vrot.lane.b32.xlu1 %v1860_v42, %s1969_s1 }
0x15c7   :  { %v951_v45 = vpop.permute.xlu1 %950 }
0x15c8   :  { %v953_v47 = vmul.f32 %v951_v45, %v948_v43 }
0x15ca   :  { %v2305_v49 = vadd.f32 %v956_v46, %v953_v47 }
0x15cc   :  { %v964_v10 = vpack.c.bf16 %v2305_v49, %v2305_v49  ;;  %v1040_v31 = vrot.slane %v2305_v49, 7 }
0x15ce   :  { %v966_v50 = vshrl.u32 %v964_v10, 16 }
0x15d0   :  { %v968_v51 = vrot.slane %v966_v50, 2 }
0x15d2   :  { %969 = vrot.lane.b32.xlu0 %v968_v51, %s1969_s1 }
0x1644   :  { %v970_v53 = vpop.permute.xlu0 %969 }
0x1645   :  { %1740 = vmatmul.mubr.msk.bf16.vlgmr.msra.gmra.mrb[16].mxu0 %vm462_vm5, %v970_v53 }
0x1646   :  { %1755 = vmatprep.mubr.msk.bf16.mxu0 %vm1968_vm2, %v1967_v14 }
0x1718   :  { %v1008_v54 = vpop.f32.mrb[16].mxu0 }
0x1719   :  { %v1009_v61 = vadd.f32 %v1008_v54, %v2181_v52  ;;  %v1741_v62 = vpop.f32.mrb[17].mxu0 }
0x171a   :  { %v1011_v63 = vpop.f32.mrb[18].mxu0 }
0x171b   :  { %v1015_v0 = vrot.slane %v1009_v61, 2  ;;  %v1742_v1 = vpop.f32.mrb[19].mxu0 }
0x171d   :  { %1024 = vrot.lane.b32.xlu1 %v1015_v0, %s1963_s0  ;;  %v1017_v2 = vadd.f32 %v1015_v0, %v2202_v55 }
0x171f   :  { %v1583_v56 = vmul.f32 -1.442695, %v1017_v2 }
0x1721   :  { %1861 = vpow2.f32 %v1583_v56 }
0x172b   :  { %v1862_v20 = vpop.eup %1861 }
0x172c   :  { %v1021_v24 = vadd.f32 1.0, %v1862_v20 }
0x172e   :  { %1863 = vrcp.f32 %v1021_v24 }
0x1738   :  { %v1864_v25 = vpop.eup %1863 }
0x1739   :  { %v1034_v58 = vsub.f32 1.0, %v1864_v25  ;;  %v1042_v33 = vmul.f32 %v1864_v25, %v1040_v31 }
0x178f   :  { %v1025_v28 = vpop.permute.xlu1 %1024 }
0x1790   :  { %v1027_v29 = vmul.f32 %v1864_v25, %v1025_v28 }
0x1792   :  { %1029 = vrot.lane.b32.xlu0 %v1027_v29, %s1963_s0  ;;  %v1195_v29 = vld [vmem:[#allocation6 + $0xb4] sm:$0x4] }
0x1804   :  { %v1030_v30 = vpop.permute.xlu0 %1029 }
0x1805   :  { %v1032_v16 = vadd.f32 %v1030_v30, %v2202_v55  ;;  %v1196_v30 = vunpack.c.l.bf16 %v1195_v29 }
0x1807   :  { %1865 = vtanh.f32 %v1032_v16  ;;  %v1209_v16 = vld [vmem:[#allocation6 + $0xb4] sm:$0x8] }
0x1808   :  { %v1210_v31 = vunpack.c.l.bf16 %v1209_v16  ;;  %v1330_v16 = vrot.slane %v1313_v5, %v2109_v18 }
0x1811   :  { %v1866_v4 = vpop.eup %1865 }
0x1812   :  { %1036 = vrot.lane.b32.xlu1 %v1866_v4, %s1969_s1  ;;  %v1200_v4 = vrot.slane %v1196_v30, %v2092_v57 }
0x1884   :  { %v1037_v32 = vpop.permute.xlu1 %1036 }
0x1885   :  { %v1039_v34 = vmul.f32 %v1037_v32, %v1034_v58  ;;  %v1206_v58 = vrot.slane %v1196_v30, %v2031_v11  ;;  %v1201_v32 = vmul.f32 %v1200_v4, %v2052_v22 }
0x1887   :  { %v1043_v17 = vadd.f32 %v1042_v33, %v1039_v34  ;;  %v1207_v34 = vmul.f32 %v1206_v58, %v2060_v26  ;;  %v1814_v26 = vld [vmem:[#allocation6 + $0x88] sm:$0xff]  }
0x1889   :  { %v1050_v35 = vpack.c.bf16 %v1043_v17, %v1043_v17  ;;  %v1124_v0 = vrot.slane %v1043_v17, 7 }
0x188b   :  { %v1052_v36 = vrot.slane %v1050_v35, 3 }
0x188d   :  { %1053 = vrot.lane.b32.xlu0 %v1052_v36, %s1969_s1  ;;  %v1214_v36 = vrot.slane %v1210_v31, %v2188_v19 }
0x18ff   :  { %v1054_v37 = vpop.permute.xlu0 %1053 }
0x1900   :  { %1748 = vmatmul.mubr.msk.bf16.vlgmr.msra.gmra.mrb[20].mxu1 %vm462_vm5, %v1054_v37 }
0x1901   :  { %1763 = vmatprep.mubr.msk.bf16.mxu1 %vm1968_vm2, %v1967_v14 }
0x19d3   :  { %v1092_v9 = vpop.f32.mrb[20].mxu1 }
0x19d4   :  { %v1093_v39 = vadd.f32 %v1092_v9, %v2181_v52  ;;  %v1749_v40 = vpop.f32.mrb[21].mxu1 }
0x19d5   :  { %v1095_v41 = vpop.f32.mrb[22].mxu1 }
0x19d6   :  { %v1099_v42 = vrot.slane %v1093_v39, 1  ;;  %v1750_v43 = vpop.f32.mrb[23].mxu1 }
0x19d8   :  { %1108 = vrot.lane.b32.xlu1 %v1099_v42, %s1963_s0  ;;  %v1101_v44 = vadd.f32 %v1099_v42, %v2202_v55 }
0x19da   :  { %v1585_v45 = vmul.f32 -1.442695, %v1101_v44 }
0x19dc   :  { %1867 = vpow2.f32 %v1585_v45  ;;  %v1813_v45 = vld [vmem:[#allocation6 + $0x80] sm:$0xff]  }
0x19dd   :  { %1760 = vmatpush3.bf16.msra.mxu1 %v1813_v45  ;;  %v1405_v45 = vld [vmem:[#allocation6 + $0xb8] sm:$0x8] }
0x19de   :  { %1761 = vmatprep.subr.bf16.mxu1 %v1967_v14 }
0x19e1   :  { %1762 = vmatpush3.bf16.msra.mxu1 %v1814_v26  ;;  %v1406_v26 = vunpack.c.l.bf16 %v1405_v45 }
0x19e2   :  { %1775 = vmatprep.subr.bf16.mxu1 %v1967_v14 }
0x19e6   :  { %v1868_v46 = vpop.eup %1867 }
0x19e7   :  { %v1105_v47 = vadd.f32 1.0, %v1868_v46 }
0x19e9   :  { %1869 = vrcp.f32 %v1105_v47 }
0x19f3   :  { %v1870_v10 = vpop.eup %1869 }
0x19f4   :  { %v1118_v63 = vsub.f32 1.0, %v1870_v10  ;;  %v1126_v2 = vmul.f32 %v1870_v10, %v1124_v0 }
0x1a4a   :  { %v1109_v50 = vpop.permute.xlu1 %1108 }
0x1a4b   :  { %v1111_v51 = vmul.f32 %v1870_v10, %v1109_v50  ;;  %v1216_v50 = vld [vmem:[#allocation6 + $0xb8] sm:$0x1] }
0x1a4d   :  { %1113 = vrot.lane.b32.xlu0 %v1111_v51, %s1963_s0  ;;  %v1217_v51 = vunpack.c.l.bf16 %v1216_v50 }
0x1a51   :  { %537 = vrot.lane.b32.xlu0 %v2210_v48, %s1969_s1 }
0x1a55   :  { %705 = vrot.lane.b32.xlu0 %v2248_v60, %s1969_s1 }
0x1a59   :  { %875 = vrot.lane.b32.xlu0 %v2286_v27, %s1969_s1  ;;  %v1812_v27 = vld [vmem:[#allocation6 + $0x78] sm:$0xff]  }
0x1a5d   :  { %1045 = vrot.lane.b32.xlu0 %v1043_v17, %s1969_s1 }
0x1abf   :  { %v1114_v52 = vpop.permute.xlu0 %1113 }
0x1ac0   :  { %v1116_v53 = vadd.f32 %v1114_v52, %v2202_v55  ;;  %v1811_v55 = vld [vmem:[#allocation6 + $0x70] sm:$0xff]   ;;  %v1237_v52 = vrot.slane %v1217_v51, %v2023_v6 }
0x1ac1   :  { %1752 = vmatpush3.bf16.msra.mxu0 %v1811_v55 }
0x1ac2   :  { %1871 = vtanh.f32 %v1116_v53  ;;  %1753 = vmatprep.subr.bf16.mxu0 %v1967_v14 }
0x1ac3   :  { %v538_v54 = vpop.permute.xlu0 %537 }
0x1ac4   :  { %541 = vst.msk [vmem:[#allocation2] sm:$0x1] %vm540_vm7, %v538_v54  ;;  %v1242_v54 = vrot.slane %v1219_v12, %v2092_v57 }
0x1ac5   :  { %1754 = vmatpush3.bf16.msra.mxu0 %v1812_v27 }
0x1ac6   :  { %1767 = vmatprep.subr.bf16.mxu0 %v1967_v14 }
0x1ac7   :  { %v706_v61 = vpop.permute.xlu0 %705 }
0x1ac8   :  { %709 = vst.msk [vmem:[#allocation2] sm:$0x4] %vm708_vm8, %v706_v61 }
0x1acb   :  { %v876_v48 = vpop.permute.xlu0 %875 }
0x1acc   :  { %v1872_v62 = vpop.eup %1871  ;;  %879 = vst.msk [vmem:[#allocation2] sm:$0x10] %vm878_vm9, %v876_v48 }
0x1acd   :  { %1120 = vrot.lane.b32.xlu1 %v1872_v62, %s1969_s1 }
0x1acf   :  { %v1046_v60 = vpop.permute.xlu0 %1045 }
0x1ad0   :  { %1049 = vst.msk [vmem:[#allocation2] sm:$0x40] %vm1048_vm10, %v1046_v60 }
0x1ad1   :  { %620 = vrot.lane.b32.xlu1 %v2229_v13, %s1969_s1 }
0x1ad5   :  { %789 = vrot.lane.b32.xlu1 %v2267_v38, %s1969_s1 }
0x1ad9   :  { %959 = vrot.lane.b32.xlu1 %v2305_v49, %s1969_s1 }
0x1b3f   :  { %v1121_v1 = vpop.permute.xlu1 %1120 }
0x1b40   :  { %v1123_v56 = vmul.f32 %v1121_v1, %v1118_v63  ;;  %v1310_v63 = vrot.slane %v1210_v31, %v2096_v59 }
0x1b42   :  { %v2345_v13 = vadd.f32 %v1126_v2, %v1123_v56 }
0x1b43   :  { %v621_v38 = vpop.permute.xlu1 %620 }
0x1b44   :  { %624 = vst.msk [vmem:[#allocation2] sm:$0x2] %vm623_vm11, %v621_v38  ;;  %1129 = vrot.lane.b32.xlu1 %v2345_v13, %s1969_s1 }
0x1b47   :  { %v790_v49 = vpop.permute.xlu1 %789 }
0x1b48   :  { %793 = vst.msk [vmem:[#allocation2] sm:$0x8] %vm792_vm12, %v790_v49 }
0x1b4b   :  { %v960_v20 = vpop.permute.xlu1 %959 }
0x1b4c   :  { %963 = vst.msk [vmem:[#allocation2] sm:$0x20] %vm962_vm13, %v960_v20 }
0x1bb6   :  { %v1130_v24 = vpop.permute.xlu1 %1129 }
0x1bb7   :  { %1133 = vst.msk [vmem:[#allocation2] sm:$0x80] %vm1132_vm14, %v1130_v24  ;;  %v1815_v24 = vld [vmem:[#allocation6 + $0x90] sm:$0xff]  }
0x1bbe   :  { %v1134_v25 = vld [vmem:[#allocation2] sm:$0xff] }
0x1bbf   :  { %v1135_v28 = vpack.c.bf16 %v1134_v25, %v1134_v25  ;;  %v1816_v25 = vld [vmem:[#allocation6 + $0x98] sm:$0xff]  }
0x1bc1   :  { %1756 = vmatmul.mubr.msk.bf16.vlgmr.msra.gmra.mrb[20].mxu0 %vm462_vm5, %v1135_v28 }
0x1bc2   :  { %1771 = vmatprep.mubr.msk.bf16.mxu0 %vm1968_vm2, %v1967_v14  ;;  %1768 = vmatpush3.bf16.msra.mxu0 %v1815_v24 }
0x1bc3   :  { %1769 = vmatprep.subr.bf16.mxu0 %v1967_v14 }
0x1bc6   :  { %1770 = vmatpush3.bf16.msra.mxu0 %v1816_v25 }
0x1c94   :  { %v1189_v33 = vpop.f32.mrb[20].mxu0 }
0x1c95   :  { %v1202_v17 = vadd.f32 %v1201_v32, %v1189_v33  ;;  %v1757_v35 = vpop.f32.mrb[21].mxu0 }
0x1c96   :  { %v1192_v37 = vpop.f32.mrb[22].mxu0  ;;  %v1403_v35 = vrot.slane %v1217_v51, %v2050_v21 }
0x1c97   :  { %v1208_v9 = vadd.f32 %v1207_v34, %v1202_v17  ;;  %v1758_v39 = vpop.f32.mrb[23].mxu0 }
0x1c99   :  { %v1215_v40 = vadd.f32 %v1214_v36, %v1208_v9 }
0x1c9b   :  { %v1220_v41 = vsel %vm462_vm5, %v1215_v40, 0.0 }
0x1c9c   :  { %1221 = vadd.xlane.f32.xlu0 %v1220_v41 }
0x1d29   :  { %v1222_v42 = vpop.xlane.xlu0 %1221 }
0x1d2a   :  { %v1224_v43 = vmul.f32 0.03125, %v1222_v42 }
0x1d2c   :  { %v1225_v11 = vsub.f32 %v1215_v40, %v1224_v43  ;;  %v1817_v43 = vld [vmem:[#allocation6 + $0xa0] sm:$0xff]  }
0x1d2e   :  { %v1226_v44 = vmul.f32 %v1225_v11, %v1225_v11 }
0x1d30   :  { %v1227_v22 = vsel %vm462_vm5, %v1226_v44, 0.0 }
0x1d31   :  { %1228 = vadd.xlane.f32.xlu1 %v1227_v22 }
0x1dbe   :  { %v1229_v46 = vpop.xlane.xlu1 %1228 }
0x1dbf   :  { %v1230_v47 = vmul.f32 0.03125, %v1229_v46 }
0x1dc1   :  { %v1231_v10 = vadd.f32 1e-05, %v1230_v47  ;;  %v1428_v47 = vrot.slane %v1406_v26, %v2188_v19 }
0x1dc3   :  { %1873 = vrsqrt.f32 %v1231_v10 }
0x1dcd   :  { %v1874_v53 = vpop.eup %1873 }
0x1dce   :  { %v1233_v61 = vmul.f32 %v1874_v53, %v1225_v11  ;;  %v1818_v11 = vld [vmem:[#allocation6 + $0xa8] sm:$0xff]  }
0x1dd0   :  { %v1238_v48 = vmul.f32 %v1237_v52, %v1233_v61  ;;  %v1970_v61 = vmov 24  }
0x1dd1   :  { %1796 = vset.pattern.permute.xlu0 %v1970_v61 }
0x1dd2   :  { %v1243_v62 = vadd.f32 %v1242_v54, %v1238_v48  ;;  %v1496_v48 = vrot.slane %v1406_v26, %v2096_v59 }
0x1dd4   :  { %vm1244_vm15 = vcmp.gt.f32.partialorder %v1243_v62, 0.0  ;;  %v1245_v60 = vmul.f32 0.01, %v1243_v62 }
0x1dd6   :  { %v1246_v55 = vsel %vm1244_vm15, %v1243_v62, %v1245_v60 }
0x1dd7   :  { %v1247_v27 = vpack.c.bf16 %v1246_v55, %v1246_v55 }
0x1dd9   :  { %1764 = vmatmul.mubr.msk.bf16.vlgmr.msra.gmra.mrb[24].mxu1 %vm462_vm5, %v1247_v27 }
0x1dda   :  { %1779 = vmatprep.mubr.msk.bf16.mxu1 %vm1968_vm2, %v1967_v14  ;;  %1776 = vmatpush3.bf16.msra.mxu1 %v1817_v43  ;;  %vm1514_vm2 = vcmp.lt.f32.partialorder %v2055_v23, 8000.0 }
0x1ddb   :  { %1777 = vmatprep.subr.bf16.mxu1 %v1967_v14 }
0x1dde   :  { %1778 = vmatpush3.bf16.msra.mxu1 %v1818_v11 }
0x1eac   :  { %v1301_v6 = vpop.f32.mrb[24].mxu1 }
0x1ead   :  { %v1311_v0 = vadd.f32 %v1310_v63, %v1301_v6  ;;  %v1765_v1 = vpop.f32.mrb[25].mxu1 }
0x1eae   :  { %v1304_v2 = vpop.f32.mrb[26].mxu1 }
0x1eaf   :  { %v1766_v8 = vpop.f32.mrb[27].mxu1  ;;  %v1314_v12 = vsel %vm462_vm5, %v1311_v0, 0.0 }
0x1eb0   :  { %1315 = vadd.xlane.f32.xlu0 %v1314_v12 }
0x1f3d   :  { %v1316_v57 = vpop.xlane.xlu0 %1315 }
0x1f3e   :  { %v1317_v56 = vmul.f32 0.03125, %v1316_v57  ;;  %v1599_v57 = vsel %vm1514_vm2, 1.0, %v1967_v14 }
0x1f40   :  { %v1318_v38 = vsub.f32 %v1311_v0, %v1317_v56 }
0x1f42   :  { %v1319_v49 = vmul.f32 %v1318_v38, %v1318_v38 }
0x1f44   :  { %v1320_v20 = vsel %vm462_vm5, %v1319_v49, 0.0  ;;  %v1517_v49 = vadd.f32 0.0001, %v1599_v57 }
0x1f45   :  { %1321 = vadd.xlane.f32.xlu0 %v1320_v20 }
0x1fd2   :  { %v1322_v28 = vpop.xlane.xlu0 %1321 }
0x1fd3   :  { %v1323_v29 = vmul.f32 0.03125, %v1322_v28 }
0x1fd5   :  { %v1324_v30 = vadd.f32 1e-05, %v1323_v29 }
0x1fd7   :  { %1875 = vrsqrt.f32 %v1324_v30 }
0x1fe1   :  { %v1876_v4 = vpop.eup %1875 }
0x1fe2   :  { %v1326_v58 = vmul.f32 %v1876_v4, %v1318_v38 }
0x1fe4   :  { %v1331_v31 = vmul.f32 %v1330_v16, %v1326_v58 }
0x1fe6   :  { %v1336_v32 = vadd.f32 %v2044_v15, %v1331_v31 }
0x1fe8   :  { %vm1337_vm0 = vcmp.gt.f32.partialorder %v1336_v32, 0.0  ;;  %v1338_v33 = vmul.f32 0.01, %v1336_v32 }
0x1fea   :  { %v1339_v34 = vsel %vm1337_vm0, %v1336_v32, %v1338_v33 }
0x1feb   :  { %v1340_v17 = vpack.c.bf16 %v1339_v34, %v1339_v34 }
0x1fed   :  { %1772 = vmatmul.mubr.msk.bf16.vlgmr.msra.gmra.mrb[24].mxu0 %vm462_vm5, %v1340_v17 }
0x20c0   :  { %v1394_v36 = vpop.f32.mrb[24].mxu0 }
0x20c1   :  { %v1404_v37 = vadd.f32 %v1403_v35, %v1394_v36  ;;  %v1773_v9 = vpop.f32.mrb[25].mxu0 }
0x20c2   :  { %v1397_v39 = vpop.f32.mrb[26].mxu0 }
0x20c3   :  { %v1774_v40 = vpop.f32.mrb[27].mxu0  ;;  %v1407_v18 = vsel %vm462_vm5, %v1404_v37, 0.0 }
0x20c4   :  { %1408 = vadd.xlane.f32.xlu1 %v1407_v18 }
0x2151   :  { %v1409_v3 = vpop.xlane.xlu1 %1408 }
0x2152   :  { %v1410_v5 = vmul.f32 0.03125, %v1409_v3 }
0x2154   :  { %v1411_v41 = vsub.f32 %v1404_v37, %v1410_v5 }
0x2156   :  { %v1412_v15 = vmul.f32 %v1411_v41, %v1411_v41 }
0x2158   :  { %v1413_v42 = vsel %vm462_vm5, %v1412_v15, 0.0 }
0x2159   :  { %1414 = vadd.xlane.f32.xlu0 %v1413_v42 }
0x21e6   :  { %v1415_v21 = vpop.xlane.xlu0 %1414 }
0x21e7   :  { %v1416_v44 = vmul.f32 0.03125, %v1415_v21 }
0x21e9   :  { %v1417_v22 = vadd.f32 1e-05, %v1416_v44 }
0x21eb   :  { %1877 = vrsqrt.f32 %v1417_v22 }
0x21f5   :  { %v1878_v46 = vpop.eup %1877 }
0x21f6   :  { %v1419_v10 = vmul.f32 %v1878_v46, %v1411_v41 }
0x21f8   :  { %v1424_v50 = vmul.f32 %v2143_v7, %v1419_v10 }
0x21fa   :  { %v1429_v51 = vadd.f32 %v1428_v47, %v1424_v50 }
0x21fc   :  { %vm1430_vm1 = vcmp.gt.f32.partialorder %v1429_v51, 0.0  ;;  %v1431_v52 = vmul.f32 0.01, %v1429_v51 }
0x21fe   :  { %v1432_v53 = vsel %vm1430_vm1, %v1429_v51, %v1431_v52 }
0x21ff   :  { %v1433_v54 = vpack.c.bf16 %v1432_v53, %v1432_v53 }
0x2201   :  { %1780 = vmatmul.mubr.msk.bf16.vlgmr.msra.gmra.mrb[28].mxu1 %vm462_vm5, %v1433_v54  ;;  %vm1534_vm5 = vcmask 523527  }
0x22d4   :  { %v1487_v62 = vpop.f32.mrb[28].mxu1 }
0x22d5   :  { %v1497_v60 = vadd.f32 %v1496_v48, %v1487_v62  ;;  %v1781_v55 = vpop.f32.mrb[29].mxu1 }
0x22d6   :  { %v1490_v27 = vpop.f32.mrb[30].mxu1 }
0x22d7   :  { %v1598_v63 = vmul.f32 -1.442695, %v1497_v60  ;;  %v1782_v19 = vpop.f32.mrb[31].mxu1 }
0x22d9   :  { %1879 = vpow2.f32 %v1598_v63 }
0x22e3   :  { %v1880_v6 = vpop.eup %1879 }
0x22e4   :  { %v1501_v7 = vadd.f32 1.0, %v1880_v6 }
0x22e6   :  { %1881 = vrcp.f32 %v1501_v7 }
0x22f0   :  { %v1882_v0 = vpop.eup %1881 }
0x22f1   :  { %1883 = vlog2.f32 %v1882_v0 }
0x22fb   :  { %v1884_v1 = vpop.eup %1883 }
0x22fc   :  { %v1505_v2 = vmul.f32 0.6931472, %v1884_v1 }
0x22fe   :  { %v1506_v8 = vmul.f32 2.3025851, %v1505_v2 }
0x2300   :  { %v1507_v12 = vmul.f32 1.442695, %v1506_v8 }
0x2302   :  { %1885 = vpow2.f32 %v1507_v12 }
0x230c   :  { %v1886_v59 = vpop.eup %1885 }
0x230d   :  { %v1509_v56 = vmul.f32 2.0, %v1886_v59 }
0x230f   :  { %v1510_v38 = vadd.f32 1e-07, %v1509_v56 }
0x2311   :  { %1527 = vperm.xlu0 %1796, %v1510_v38   ;;  %v1518_v20 = vmul.f32 %v1517_v49, %v1510_v38 }
0x2313   :  { %v1520_v24 = vsel %vm1519_vm3, %v1518_v20, 0.0 }
0x2314   :  { %1521 = vadd.xlane.f32.xlu1 %v1520_v24 }
0x2390   :  { %v1528_v30 = vpop.permute.xlu0 %1527 }
0x23a1   :  { %v1522_v25 = vpop.xlane.xlu1 %1521 }
0x23a2   :  { %1887 = vrcp.f32 %v1522_v25 }
0x23ac   :  { %v1888_v28 = vpop.eup %1887 }
0x23ad   :  { %v1524_v29 = vmul.f32 %v1888_v28, %v1518_v20 }
0x23af   :  { %v1530_v16 = vmul.f32 %v1528_v30, %v1524_v29 }
0x23b1   :  { %1531 = vst.msk [vmem:[#allocation8] sm:$0xff] %vm1519_vm3, %v1530_v16 }
0x23b2   :  { %1533 = vst.msk [vmem:[#allocation8] sm:$0xff] %vm1532_vm4, %v1510_v38 }
0x23b3   :  { %1535 = vst.msk [vmem:[#allocation8 - $0x7] sm:$0x80] %vm1534_vm5, %v2345_v13 }
0x23b4   :  { %1944 = shalt.err (!%p1941_p6)
}
0x23b5   :  { %s1945_s11 = scalar_lea.hbm %s2402_s2, 128 }
0x23b6   :  { %p1946_p7 = scmp.ne.s32.totalorder %s2402_s2, %s1945_s11  ;;  %p1949_p8 = scmp.lt.u32.totalorder %s1945_s11, %s2402_s2 }
0x23b8   :  { %p1951_p9 = pnand %p1949_p8, %p1946_p7 }
0x23ba   :  { %1954 = shalt.err (!%p1951_p9)
}
0x23bb   :  { %1545 = dma.vmem_to_hbm [thread:$0]  %s1543_s7, 128, %s2402_s2, [#allocation5]  }
0x23bc   :  { %1959 = dma.done.wait [#allocation5], 128  }
0x23bd   :  { %1960 = vsyncadd [#allocation5], 4294967168 }
0x23be   :  { %1549 = vsyncpa [#allocation4], 1 }
0x23bf   :  { %1550 = vsyncpa [#allocation7], 1 }
0x23c0   :  { %1551 = vsyncpa [#allocation5], 1 }

</bundles_post_ra>
